<compile_context>
chip_gen: v7x
topology: tpu7x:2x2x1
jax: 0.10.0
libtpu: 0.0.40
codegen_flags: <defaults>
</compile_context>

<pallas_src>
import math

import jax
import jax.numpy as jnp
from jax.experimental import pallas as pl
from jax.experimental.pallas import tpu as pltpu

# ----------------------------- synthetic BERT config -----------------------------
VOCAB_SIZE = 100
MAX_POS = 16
TYPE_VOCAB = 2
HIDDEN = 32           # bert_model.config.hidden_size  (embedding_dim in the module)
NUM_HEADS = 2
HEAD_DIM = HIDDEN // NUM_HEADS
INTERMEDIATE = 64
NUM_LAYERS = 2
NUM_CLASSES = 3
LN_EPS = 1e-12

BATCH = 2
SEQ = 8

_ATT_SCALE = 1.0 / math.sqrt(HEAD_DIM)
_GELU_C = math.sqrt(2.0 / math.pi)


# ------------------------------- in-kernel helpers -------------------------------
def _layernorm(x, g, b):
    mu = jnp.mean(x, axis=-1, keepdims=True)
    var = jnp.mean((x - mu) * (x - mu), axis=-1, keepdims=True)
    return (x - mu) * jax.lax.rsqrt(var + LN_EPS) * g + b


def _gelu(x):
    # TODO(synk): HF BERT uses exact erf-GELU; tanh approximation used here.
    return 0.5 * x * (1.0 + jnp.tanh(_GELU_C * (x + 0.044715 * x * x * x)))


# ------------------------------- fused forward kernel -----------------------------
def _bert_forward_kernel(
    x_ref, mask_ref,
    emb_g_ref, emb_b_ref,
    wqkv_ref, bqkv_ref, wo_ref, bo_ref, ln1_g_ref, ln1_b_ref,
    w1_ref, b1_ref, w2_ref, b2_ref, ln2_g_ref, ln2_b_ref,
    pool_w_ref, pool_b_ref, out_w_ref, out_b_ref,
    o_ref,
):
    # embedding LayerNorm (input x_ref is word+pos+type embeddings, pre-LN)
    x = _layernorm(x_ref[...], emb_g_ref[...], emb_b_ref[...])          # (B*S, H)
    mask = mask_ref[...]                                                 # (B, S) additive

    # Per-(b,h) additive mask rows, hoisted out of the layer loop: (G, 1, S), G = B*NH
    mask_g = jnp.stack(
        [mask[b:b + 1, :] for b in range(BATCH) for _ in range(NUM_HEADS)], axis=0)

    for l in range(NUM_LAYERS):
        # ---- fused QKV projection: one MXU matmul, (B*S, 3H) output -------------
        # (attention 1/sqrt(Dh) scale is pre-folded into the Q columns of wqkv/bqkv)
        qkv = jnp.dot(x, wqkv_ref[l], preferred_element_type=jnp.float32) + bqkv_ref[l]

        # ---- gather per-(b,h) head operands as values (no VMEM scratch) ---------
        q_l, k_l, v_l = [], [], []
        for b in range(BATCH):
            r0 = b * SEQ
            for h in range(NUM_HEADS):
                c0 = h * HEAD_DIM
                q_l.append(qkv[r0:r0 + SEQ, c0:c0 + HEAD_DIM])
                k_l.append(qkv[r0:r0 + SEQ, HIDDEN + c0:HIDDEN + c0 + HEAD_DIM])
                v_l.append(qkv[r0:r0 + SEQ, 2 * HIDDEN + c0:2 * HIDDEN + c0 + HEAD_DIM])
        q = jnp.stack(q_l, axis=0)                                       # (G, S, Dh)
        k = jnp.stack(k_l, axis=0)                                       # (G, S, Dh)
        v = jnp.stack(v_l, axis=0)                                       # (G, S, Dh)

        # ---- batched masked-softmax attention over all (b, h) tiles at once -----
        s = jnp.einsum('gqd,gkd->gqk', q, k,
                       preferred_element_type=jnp.float32)               # (G, S, S)
        s = s + mask_g
        s = s - jnp.max(s, axis=-1, keepdims=True)
        p = jnp.exp(s)
        p = p / jnp.sum(p, axis=-1, keepdims=True)                       # exact divide (parity)
        ctx_g = jnp.einsum('gqk,gkd->gqd', p, v,
                           preferred_element_type=jnp.float32)           # (G, S, Dh)

        # ---- merge heads back to (B*S, H) purely with value concats -------------
        ctx = jnp.concatenate(
            [jnp.concatenate([ctx_g[b * NUM_HEADS + h] for h in range(NUM_HEADS)], axis=-1)
             for b in range(BATCH)],
            axis=0)                                                       # (B*S, H)

        # ---- attention output projection + fused residual + LN ------------------
        attn_out = jnp.dot(ctx, wo_ref[l], preferred_element_type=jnp.float32) + bo_ref[l]
        x = _layernorm(x + attn_out, ln1_g_ref[l], ln1_b_ref[l])

        # ---- FFN (GELU) + fused residual + LN ------------------------------------
        ffn = _gelu(jnp.dot(x, w1_ref[l], preferred_element_type=jnp.float32) + b1_ref[l])
        ffn = jnp.dot(ffn, w2_ref[l], preferred_element_type=jnp.float32) + b2_ref[l]
        x = _layernorm(x + ffn, ln2_g_ref[l], ln2_b_ref[l])

    # ---- pooler (tanh(Linear([CLS]))) + classifier head, in the same kernel ------
    # [CLS] rows sit at static offsets b*SEQ -> static sublane slices (no one-hot matmul).
    cls = jnp.concatenate([x[b * SEQ:b * SEQ + 1, :] for b in range(BATCH)], axis=0)   # (B, H)
    pooled = jnp.tanh(
        jnp.dot(cls, pool_w_ref[...], preferred_element_type=jnp.float32) + pool_b_ref[...])
    o_ref[...] = (
        jnp.dot(pooled, out_w_ref[...], preferred_element_type=jnp.float32) + out_b_ref[...])


# --------------------------------- Pallas wrapper ---------------------------------
_VMEM = pl.BlockSpec(memory_space=pltpu.MemorySpace.VMEM)


def bert_forward_pallas(x_emb, add_mask, params):
    args = (
        x_emb, add_mask,
        params["emb_ln_g"], params["emb_ln_b"],
        params["wqkv"], params["bqkv"], params["wo"], params["bo"],
        params["ln1_g"], params["ln1_b"],
        params["w1"], params["b1"], params["w2"], params["b2"],
        params["ln2_g"], params["ln2_b"],
        params["pool_w"], params["pool_b"], params["out_w"], params["out_b"],
    )
    return pl.pallas_call(
        _bert_forward_kernel,
        out_shape=jax.ShapeDtypeStruct((BATCH, NUM_CLASSES), jnp.float32),
        in_specs=[_VMEM] * len(args),
        out_specs=_VMEM,
        compiler_params=pltpu.CompilerParams(vmem_limit_bytes=32 * 1024 * 1024),
    )(*args)


# --------------------------------- model forward ---------------------------------
@jax.jit
def bert_nli_forward(params, sequence, attn_mask, token_type):
    B, S = sequence.shape
    # --- embeddings (gather is glue JAX) ---
    we = jnp.take(params["word_emb"], sequence, axis=0)           # (B, S, H)
    pe = params["pos_emb"][:S]                                    # (S, H)
    te = jnp.take(params["type_emb"], token_type, axis=0)         # (B, S, H)
    x = (we + pe[None, :, :] + te).reshape(B * S, HIDDEN).astype(jnp.float32)

    # --- extended additive attention mask (BERT convention) ---
    add_mask = (1.0 - attn_mask.astype(jnp.float32)) * -10000.0   # (B, S)

    # --- whole encoder stack + pooler + classifier in a single fused kernel ---
    return bert_forward_pallas(x, add_mask, params)


# --------------------------------- parameter init ---------------------------------
def init_params(key):
    keys = iter(jax.random.split(key, 64))

    def nrm(shape):
        return jax.random.normal(next(keys), shape, jnp.float32) * 0.02

    L = NUM_LAYERS
    # Fused QKV weights; the attention 1/sqrt(head_dim) scale is folded into the
    # Q columns ONCE at parameter-prep time (removes the per-tile in-kernel multiply).
    wqkv = nrm((L, HIDDEN, 3 * HIDDEN))
    wqkv = wqkv.at[:, :, :HIDDEN].multiply(_ATT_SCALE)
    bqkv = jnp.zeros((L, 1, 3 * HIDDEN), jnp.float32)
    bqkv = bqkv.at[:, :, :HIDDEN].multiply(_ATT_SCALE)

    return dict(
        word_emb=nrm((VOCAB_SIZE, HIDDEN)),
        pos_emb=nrm((MAX_POS, HIDDEN)),
        type_emb=nrm((TYPE_VOCAB, HIDDEN)),
        emb_ln_g=jnp.ones((1, HIDDEN), jnp.float32),
        emb_ln_b=jnp.zeros((1, HIDDEN), jnp.float32),
        # per-layer weights stacked on a leading layer axis; Q/K/V fused into one matmul
        wqkv=wqkv,
        bqkv=bqkv,
        wo=nrm((L, HIDDEN, HIDDEN)),
        bo=jnp.zeros((L, 1, HIDDEN), jnp.float32),
        ln1_g=jnp.ones((L, 1, HIDDEN), jnp.float32),
        ln1_b=jnp.zeros((L, 1, HIDDEN), jnp.float32),
        w1=nrm((L, HIDDEN, INTERMEDIATE)),
        b1=jnp.zeros((L, 1, INTERMEDIATE), jnp.float32),
        w2=nrm((L, INTERMEDIATE, HIDDEN)),
        b2=jnp.zeros((L, 1, HIDDEN), jnp.float32),
        ln2_g=jnp.ones((L, 1, HIDDEN), jnp.float32),
        ln2_b=jnp.zeros((L, 1, HIDDEN), jnp.float32),
        pool_w=nrm((HIDDEN, HIDDEN)),
        pool_b=jnp.zeros((1, HIDDEN), jnp.float32),
        out_w=nrm((HIDDEN, NUM_CLASSES)),
        out_b=jnp.zeros((1, NUM_CLASSES), jnp.float32),
    )


# ------------------------------------- main -------------------------------------
if __name__ == "__main__":
    root = jax.random.PRNGKey(0)
    k_param, k_ids, k_type = jax.random.split(root, 3)

    params = init_params(k_param)

    sequence = jax.random.randint(k_ids, (BATCH, SEQ), 0, VOCAB_SIZE, dtype=jnp.int32)
    attn_mask = jnp.ones((BATCH, SEQ), jnp.int32).at[1, SEQ - 2:].set(0)   # pad last 2 of row 1
    token_type = jax.random.randint(k_type, (BATCH, SEQ), 0, TYPE_VOCAB, dtype=jnp.int32)

    logits = bert_nli_forward(params, sequence, attn_mask, token_type)
    logits = jax.block_until_ready(logits)

    assert logits.shape == (BATCH, NUM_CLASSES)
    assert bool(jnp.all(jnp.isfinite(logits)))
    print("KERNEL_OK")
</pallas_src>

<mosaic_0001>
module attributes {stable_mosaic.version = 11 : i64} {
  func.func @_bert_forward_kernel(%arg0: memref<16x32xf32, #tpu.memory_space<vmem>>, %arg1: memref<2x8xf32, #tpu.memory_space<vmem>>, %arg2: memref<1x32xf32, #tpu.memory_space<vmem>>, %arg3: memref<1x32xf32, #tpu.memory_space<vmem>>, %arg4: memref<2x32x96xf32, #tpu.memory_space<vmem>>, %arg5: memref<2x1x96xf32, #tpu.memory_space<vmem>>, %arg6: memref<2x32x32xf32, #tpu.memory_space<vmem>>, %arg7: memref<2x1x32xf32, #tpu.memory_space<vmem>>, %arg8: memref<2x1x32xf32, #tpu.memory_space<vmem>>, %arg9: memref<2x1x32xf32, #tpu.memory_space<vmem>>, %arg10: memref<2x32x64xf32, #tpu.memory_space<vmem>>, %arg11: memref<2x1x64xf32, #tpu.memory_space<vmem>>, %arg12: memref<2x64x32xf32, #tpu.memory_space<vmem>>, %arg13: memref<2x1x32xf32, #tpu.memory_space<vmem>>, %arg14: memref<2x1x32xf32, #tpu.memory_space<vmem>>, %arg15: memref<2x1x32xf32, #tpu.memory_space<vmem>>, %arg16: memref<32x32xf32, #tpu.memory_space<vmem>>, %arg17: memref<1x32xf32, #tpu.memory_space<vmem>>, %arg18: memref<32x3xf32, #tpu.memory_space<vmem>>, %arg19: memref<1x3xf32, #tpu.memory_space<vmem>>, %arg20: memref<2x3xf32, #tpu.memory_space<vmem>>) attributes {dimension_semantics = [], scalar_prefetch = 0 : i64, scratch_operands = 0 : i64, tpu.core_type = #tpu.core_type<tc>} {
    %c0 = arith.constant 0 : index
    %c0_0 = arith.constant 0 : index
    %0 = vector.load %arg0[%c0, %c0_0] : memref<16x32xf32, #tpu.memory_space<vmem>>, vector<16x32xf32>
    %c0_1 = arith.constant 0 : index
    %c0_2 = arith.constant 0 : index
    %1 = vector.load %arg2[%c0_1, %c0_2] : memref<1x32xf32, #tpu.memory_space<vmem>>, vector<1x32xf32>
    %c0_3 = arith.constant 0 : index
    %c0_4 = arith.constant 0 : index
    %2 = vector.load %arg3[%c0_3, %c0_4] : memref<1x32xf32, #tpu.memory_space<vmem>>, vector<1x32xf32>
    %cst = arith.constant dense<0.000000e+00> : vector<16xf32>
    %3 = vector.multi_reduction <add>, %0, %cst [1] : vector<16x32xf32> to vector<16xf32>
    %4 = vector.shape_cast %3 : vector<16xf32> to vector<16x1xf32>
    %cst_5 = arith.constant 3.200000e+01 : f32
    %5 = vector.broadcast %cst_5 : f32 to vector<16x1xf32>
    %6 = arith.divf %4, %5 : vector<16x1xf32>
    %7 = vector.broadcast %6 : vector<16x1xf32> to vector<16x32xf32>
    %8 = arith.subf %0, %7 : vector<16x32xf32>
    %9 = vector.broadcast %6 : vector<16x1xf32> to vector<16x32xf32>
    %10 = arith.subf %0, %9 : vector<16x32xf32>
    %11 = arith.mulf %8, %10 : vector<16x32xf32>
    %cst_6 = arith.constant dense<0.000000e+00> : vector<16xf32>
    %12 = vector.multi_reduction <add>, %11, %cst_6 [1] : vector<16x32xf32> to vector<16xf32>
    %13 = vector.shape_cast %12 : vector<16xf32> to vector<16x1xf32>
    %cst_7 = arith.constant 3.200000e+01 : f32
    %14 = vector.broadcast %cst_7 : f32 to vector<16x1xf32>
    %15 = arith.divf %13, %14 : vector<16x1xf32>
    %16 = vector.broadcast %6 : vector<16x1xf32> to vector<16x32xf32>
    %17 = arith.subf %0, %16 : vector<16x32xf32>
    %cst_8 = arith.constant 9.99999996E-13 : f32
    %18 = vector.broadcast %cst_8 : f32 to vector<16x1xf32>
    %19 = arith.addf %15, %18 : vector<16x1xf32>
    %20 = math.rsqrt %19 : vector<16x1xf32>
    %21 = vector.broadcast %20 : vector<16x1xf32> to vector<16x32xf32>
    %22 = arith.mulf %17, %21 : vector<16x32xf32>
    %23 = vector.broadcast %1 : vector<1x32xf32> to vector<16x32xf32>
    %24 = arith.mulf %22, %23 : vector<16x32xf32>
    %25 = vector.broadcast %2 : vector<1x32xf32> to vector<16x32xf32>
    %26 = arith.addf %24, %25 : vector<16x32xf32>
    %c0_9 = arith.constant 0 : index
    %c0_10 = arith.constant 0 : index
    %27 = vector.load %arg1[%c0_9, %c0_10] : memref<2x8xf32, #tpu.memory_space<vmem>>, vector<2x8xf32>
    %28 = vector.extract_strided_slice %27 {offsets = [0, 0], sizes = [1, 8], strides = [1, 1]} : vector<2x8xf32> to vector<1x8xf32>
    %29 = vector.extract_strided_slice %27 {offsets = [0, 0], sizes = [1, 8], strides = [1, 1]} : vector<2x8xf32> to vector<1x8xf32>
    %30 = vector.extract_strided_slice %27 {offsets = [1, 0], sizes = [1, 8], strides = [1, 1]} : vector<2x8xf32> to vector<1x8xf32>
    %31 = vector.extract_strided_slice %27 {offsets = [1, 0], sizes = [1, 8], strides = [1, 1]} : vector<2x8xf32> to vector<1x8xf32>
    %32 = vector.shape_cast %28 : vector<1x8xf32> to vector<1x1x8xf32>
    %33 = vector.shape_cast %29 : vector<1x8xf32> to vector<1x1x8xf32>
    %34 = vector.shape_cast %30 : vector<1x8xf32> to vector<1x1x8xf32>
    %35 = vector.shape_cast %31 : vector<1x8xf32> to vector<1x1x8xf32>
    %36 = tpu.concatenate %32, %33, %34, %35 in 0 : vector<1x1x8xf32>, vector<1x1x8xf32>, vector<1x1x8xf32>, vector<1x1x8xf32> -> vector<4x1x8xf32>
    %c0_11 = arith.constant 0 : index
    %c0_12 = arith.constant 0 : index
    %c0_13 = arith.constant 0 : index
    %37 = vector.load %arg4[%c0_11, %c0_12, %c0_13] : memref<2x32x96xf32, #tpu.memory_space<vmem>>, vector<1x32x96xf32>
    %38 = vector.shape_cast %37 : vector<1x32x96xf32> to vector<32x96xf32>
    %cst_14 = arith.constant dense<0.000000e+00> : vector<16x96xf32>
    %39 = tpu.matmul %26, %38, %cst_14 {dimension_numbers = #tpu.dot_dimension_numbers<[1], [0], [0], [1], [0, 0, 1, 1], [], []>} : vector<16x32xf32>, vector<32x96xf32>, vector<16x96xf32> -> vector<16x96xf32>
    %c0_15 = arith.constant 0 : index
    %c0_16 = arith.constant 0 : index
    %c0_17 = arith.constant 0 : index
    %40 = vector.load %arg5[%c0_15, %c0_16, %c0_17] : memref<2x1x96xf32, #tpu.memory_space<vmem>>, vector<1x1x96xf32>
    %41 = vector.shape_cast %40 : vector<1x1x96xf32> to vector<1x96xf32>
    %42 = vector.broadcast %41 : vector<1x96xf32> to vector<16x96xf32>
    %43 = arith.addf %39, %42 : vector<16x96xf32>
    %44 = vector.extract_strided_slice %43 {offsets = [0, 0], sizes = [8, 16], strides = [1, 1]} : vector<16x96xf32> to vector<8x16xf32>
    %45 = vector.extract_strided_slice %43 {offsets = [0, 32], sizes = [8, 16], strides = [1, 1]} : vector<16x96xf32> to vector<8x16xf32>
    %46 = vector.extract_strided_slice %43 {offsets = [0, 64], sizes = [8, 16], strides = [1, 1]} : vector<16x96xf32> to vector<8x16xf32>
    %47 = vector.extract_strided_slice %43 {offsets = [0, 16], sizes = [8, 16], strides = [1, 1]} : vector<16x96xf32> to vector<8x16xf32>
    %48 = vector.extract_strided_slice %43 {offsets = [0, 48], sizes = [8, 16], strides = [1, 1]} : vector<16x96xf32> to vector<8x16xf32>
    %49 = vector.extract_strided_slice %43 {offsets = [0, 80], sizes = [8, 16], strides = [1, 1]} : vector<16x96xf32> to vector<8x16xf32>
    %50 = vector.extract_strided_slice %43 {offsets = [8, 0], sizes = [8, 16], strides = [1, 1]} : vector<16x96xf32> to vector<8x16xf32>
    %51 = vector.extract_strided_slice %43 {offsets = [8, 32], sizes = [8, 16], strides = [1, 1]} : vector<16x96xf32> to vector<8x16xf32>
    %52 = vector.extract_strided_slice %43 {offsets = [8, 64], sizes = [8, 16], strides = [1, 1]} : vector<16x96xf32> to vector<8x16xf32>
    %53 = vector.extract_strided_slice %43 {offsets = [8, 16], sizes = [8, 16], strides = [1, 1]} : vector<16x96xf32> to vector<8x16xf32>
    %54 = vector.extract_strided_slice %43 {offsets = [8, 48], sizes = [8, 16], strides = [1, 1]} : vector<16x96xf32> to vector<8x16xf32>
    %55 = vector.extract_strided_slice %43 {offsets = [8, 80], sizes = [8, 16], strides = [1, 1]} : vector<16x96xf32> to vector<8x16xf32>
    %56 = vector.shape_cast %44 : vector<8x16xf32> to vector<1x8x16xf32>
    %57 = vector.shape_cast %47 : vector<8x16xf32> to vector<1x8x16xf32>
    %58 = vector.shape_cast %50 : vector<8x16xf32> to vector<1x8x16xf32>
    %59 = vector.shape_cast %53 : vector<8x16xf32> to vector<1x8x16xf32>
    %60 = tpu.concatenate %56, %57, %58, %59 in 0 : vector<1x8x16xf32>, vector<1x8x16xf32>, vector<1x8x16xf32>, vector<1x8x16xf32> -> vector<4x8x16xf32>
    %61 = vector.shape_cast %45 : vector<8x16xf32> to vector<1x8x16xf32>
    %62 = vector.shape_cast %48 : vector<8x16xf32> to vector<1x8x16xf32>
    %63 = vector.shape_cast %51 : vector<8x16xf32> to vector<1x8x16xf32>
    %64 = vector.shape_cast %54 : vector<8x16xf32> to vector<1x8x16xf32>
    %65 = tpu.concatenate %61, %62, %63, %64 in 0 : vector<1x8x16xf32>, vector<1x8x16xf32>, vector<1x8x16xf32>, vector<1x8x16xf32> -> vector<4x8x16xf32>
    %66 = vector.shape_cast %46 : vector<8x16xf32> to vector<1x8x16xf32>
    %67 = vector.shape_cast %49 : vector<8x16xf32> to vector<1x8x16xf32>
    %68 = vector.shape_cast %52 : vector<8x16xf32> to vector<1x8x16xf32>
    %69 = vector.shape_cast %55 : vector<8x16xf32> to vector<1x8x16xf32>
    %70 = tpu.concatenate %66, %67, %68, %69 in 0 : vector<1x8x16xf32>, vector<1x8x16xf32>, vector<1x8x16xf32>, vector<1x8x16xf32> -> vector<4x8x16xf32>
    "tpu.trace_start"() <{level = 10 : i32, message = "gqd,gkd->gqk"}> : () -> ()
    %cst_18 = arith.constant dense<0.000000e+00> : vector<4x8x8xf32>
    %71 = tpu.matmul %60, %65, %cst_18 {dimension_numbers = #tpu.dot_dimension_numbers<[2], [2], [1], [1], [0, 0, 0, 1, 1, 1], [0], [0]>} : vector<4x8x16xf32>, vector<4x8x16xf32>, vector<4x8x8xf32> -> vector<4x8x8xf32>
    "tpu.trace_stop"() : () -> ()
    %72 = vector.broadcast %36 : vector<4x1x8xf32> to vector<4x8x8xf32>
    %73 = arith.addf %71, %72 : vector<4x8x8xf32>
    %cst_19 = arith.constant dense<0xFF800000> : vector<4x8xf32>
    %74 = vector.multi_reduction <maximumf>, %73, %cst_19 [2] : vector<4x8x8xf32> to vector<4x8xf32>
    %75 = vector.shape_cast %74 : vector<4x8xf32> to vector<4x8x1xf32>
    %76 = vector.broadcast %75 : vector<4x8x1xf32> to vector<4x8x8xf32>
    %77 = arith.subf %73, %76 : vector<4x8x8xf32>
    %78 = math.exp %77 : vector<4x8x8xf32>
    %cst_20 = arith.constant dense<0.000000e+00> : vector<4x8xf32>
    %79 = vector.multi_reduction <add>, %78, %cst_20 [2] : vector<4x8x8xf32> to vector<4x8xf32>
    %80 = vector.shape_cast %79 : vector<4x8xf32> to vector<4x8x1xf32>
    %81 = vector.broadcast %80 : vector<4x8x1xf32> to vector<4x8x8xf32>
    %82 = arith.divf %78, %81 : vector<4x8x8xf32>
    "tpu.trace_start"() <{level = 10 : i32, message = "gqk,gkd->gqd"}> : () -> ()
    %cst_21 = arith.constant dense<0.000000e+00> : vector<4x8x16xf32>
    %83 = tpu.matmul %82, %70, %cst_21 {dimension_numbers = #tpu.dot_dimension_numbers<[2], [1], [1], [2], [0, 0, 0, 1, 1, 2], [0], [0]>} : vector<4x8x8xf32>, vector<4x8x16xf32>, vector<4x8x16xf32> -> vector<4x8x16xf32>
    "tpu.trace_stop"() : () -> ()
    %84 = vector.extract_strided_slice %83 {offsets = [0, 0, 0], sizes = [1, 8, 16], strides = [1, 1, 1]} : vector<4x8x16xf32> to vector<1x8x16xf32>
    %85 = vector.shape_cast %84 : vector<1x8x16xf32> to vector<8x16xf32>
    %86 = vector.extract_strided_slice %83 {offsets = [1, 0, 0], sizes = [1, 8, 16], strides = [1, 1, 1]} : vector<4x8x16xf32> to vector<1x8x16xf32>
    %87 = vector.shape_cast %86 : vector<1x8x16xf32> to vector<8x16xf32>
    %88 = tpu.concatenate %85, %87 in 1 : vector<8x16xf32>, vector<8x16xf32> -> vector<8x32xf32>
    %89 = vector.extract_strided_slice %83 {offsets = [2, 0, 0], sizes = [1, 8, 16], strides = [1, 1, 1]} : vector<4x8x16xf32> to vector<1x8x16xf32>
    %90 = vector.shape_cast %89 : vector<1x8x16xf32> to vector<8x16xf32>
    %91 = vector.extract_strided_slice %83 {offsets = [3, 0, 0], sizes = [1, 8, 16], strides = [1, 1, 1]} : vector<4x8x16xf32> to vector<1x8x16xf32>
    %92 = vector.shape_cast %91 : vector<1x8x16xf32> to vector<8x16xf32>
    %93 = tpu.concatenate %90, %92 in 1 : vector<8x16xf32>, vector<8x16xf32> -> vector<8x32xf32>
    %94 = tpu.concatenate %88, %93 in 0 : vector<8x32xf32>, vector<8x32xf32> -> vector<16x32xf32>
    %c0_22 = arith.constant 0 : index
    %c0_23 = arith.constant 0 : index
    %c0_24 = arith.constant 0 : index
    %95 = vector.load %arg6[%c0_22, %c0_23, %c0_24] : memref<2x32x32xf32, #tpu.memory_space<vmem>>, vector<1x32x32xf32>
    %96 = vector.shape_cast %95 : vector<1x32x32xf32> to vector<32x32xf32>
    %cst_25 = arith.constant dense<0.000000e+00> : vector<16x32xf32>
    %97 = tpu.matmul %94, %96, %cst_25 {dimension_numbers = #tpu.dot_dimension_numbers<[1], [0], [0], [1], [0, 0, 1, 1], [], []>} : vector<16x32xf32>, vector<32x32xf32>, vector<16x32xf32> -> vector<16x32xf32>
    %c0_26 = arith.constant 0 : index
    %c0_27 = arith.constant 0 : index
    %c0_28 = arith.constant 0 : index
    %98 = vector.load %arg7[%c0_26, %c0_27, %c0_28] : memref<2x1x32xf32, #tpu.memory_space<vmem>>, vector<1x1x32xf32>
    %99 = vector.shape_cast %98 : vector<1x1x32xf32> to vector<1x32xf32>
    %100 = vector.broadcast %99 : vector<1x32xf32> to vector<16x32xf32>
    %101 = arith.addf %97, %100 : vector<16x32xf32>
    %102 = arith.addf %26, %101 : vector<16x32xf32>
    %c0_29 = arith.constant 0 : index
    %c0_30 = arith.constant 0 : index
    %c0_31 = arith.constant 0 : index
    %103 = vector.load %arg8[%c0_29, %c0_30, %c0_31] : memref<2x1x32xf32, #tpu.memory_space<vmem>>, vector<1x1x32xf32>
    %104 = vector.shape_cast %103 : vector<1x1x32xf32> to vector<1x32xf32>
    %c0_32 = arith.constant 0 : index
    %c0_33 = arith.constant 0 : index
    %c0_34 = arith.constant 0 : index
    %105 = vector.load %arg9[%c0_32, %c0_33, %c0_34] : memref<2x1x32xf32, #tpu.memory_space<vmem>>, vector<1x1x32xf32>
    %106 = vector.shape_cast %105 : vector<1x1x32xf32> to vector<1x32xf32>
    %cst_35 = arith.constant dense<0.000000e+00> : vector<16xf32>
    %107 = vector.multi_reduction <add>, %102, %cst_35 [1] : vector<16x32xf32> to vector<16xf32>
    %108 = vector.shape_cast %107 : vector<16xf32> to vector<16x1xf32>
    %cst_36 = arith.constant 3.200000e+01 : f32
    %109 = vector.broadcast %cst_36 : f32 to vector<16x1xf32>
    %110 = arith.divf %108, %109 : vector<16x1xf32>
    %111 = vector.broadcast %110 : vector<16x1xf32> to vector<16x32xf32>
    %112 = arith.subf %102, %111 : vector<16x32xf32>
    %113 = vector.broadcast %110 : vector<16x1xf32> to vector<16x32xf32>
    %114 = arith.subf %102, %113 : vector<16x32xf32>
    %115 = arith.mulf %112, %114 : vector<16x32xf32>
    %cst_37 = arith.constant dense<0.000000e+00> : vector<16xf32>
    %116 = vector.multi_reduction <add>, %115, %cst_37 [1] : vector<16x32xf32> to vector<16xf32>
    %117 = vector.shape_cast %116 : vector<16xf32> to vector<16x1xf32>
    %cst_38 = arith.constant 3.200000e+01 : f32
    %118 = vector.broadcast %cst_38 : f32 to vector<16x1xf32>
    %119 = arith.divf %117, %118 : vector<16x1xf32>
    %120 = vector.broadcast %110 : vector<16x1xf32> to vector<16x32xf32>
    %121 = arith.subf %102, %120 : vector<16x32xf32>
    %cst_39 = arith.constant 9.99999996E-13 : f32
    %122 = vector.broadcast %cst_39 : f32 to vector<16x1xf32>
    %123 = arith.addf %119, %122 : vector<16x1xf32>
    %124 = math.rsqrt %123 : vector<16x1xf32>
    %125 = vector.broadcast %124 : vector<16x1xf32> to vector<16x32xf32>
    %126 = arith.mulf %121, %125 : vector<16x32xf32>
    %127 = vector.broadcast %104 : vector<1x32xf32> to vector<16x32xf32>
    %128 = arith.mulf %126, %127 : vector<16x32xf32>
    %129 = vector.broadcast %106 : vector<1x32xf32> to vector<16x32xf32>
    %130 = arith.addf %128, %129 : vector<16x32xf32>
    %c0_40 = arith.constant 0 : index
    %c0_41 = arith.constant 0 : index
    %c0_42 = arith.constant 0 : index
    %131 = vector.load %arg10[%c0_40, %c0_41, %c0_42] : memref<2x32x64xf32, #tpu.memory_space<vmem>>, vector<1x32x64xf32>
    %132 = vector.shape_cast %131 : vector<1x32x64xf32> to vector<32x64xf32>
    %cst_43 = arith.constant dense<0.000000e+00> : vector<16x64xf32>
    %133 = tpu.matmul %130, %132, %cst_43 {dimension_numbers = #tpu.dot_dimension_numbers<[1], [0], [0], [1], [0, 0, 1, 1], [], []>} : vector<16x32xf32>, vector<32x64xf32>, vector<16x64xf32> -> vector<16x64xf32>
    %c0_44 = arith.constant 0 : index
    %c0_45 = arith.constant 0 : index
    %c0_46 = arith.constant 0 : index
    %134 = vector.load %arg11[%c0_44, %c0_45, %c0_46] : memref<2x1x64xf32, #tpu.memory_space<vmem>>, vector<1x1x64xf32>
    %135 = vector.shape_cast %134 : vector<1x1x64xf32> to vector<1x64xf32>
    %136 = vector.broadcast %135 : vector<1x64xf32> to vector<16x64xf32>
    %137 = arith.addf %133, %136 : vector<16x64xf32>
    %cst_47 = arith.constant 5.000000e-01 : f32
    %138 = vector.broadcast %cst_47 : f32 to vector<16x64xf32>
    %139 = arith.mulf %138, %137 : vector<16x64xf32>
    %cst_48 = arith.constant 4.471500e-02 : f32
    %140 = vector.broadcast %cst_48 : f32 to vector<16x64xf32>
    %141 = arith.mulf %140, %137 : vector<16x64xf32>
    %142 = arith.mulf %141, %137 : vector<16x64xf32>
    %143 = arith.mulf %142, %137 : vector<16x64xf32>
    %144 = arith.addf %137, %143 : vector<16x64xf32>
    %cst_49 = arith.constant 0.797884583 : f32
    %145 = vector.broadcast %cst_49 : f32 to vector<16x64xf32>
    %146 = arith.mulf %145, %144 : vector<16x64xf32>
    %147 = math.tanh %146 : vector<16x64xf32>
    %cst_50 = arith.constant 1.000000e+00 : f32
    %148 = vector.broadcast %cst_50 : f32 to vector<16x64xf32>
    %149 = arith.addf %148, %147 : vector<16x64xf32>
    %150 = arith.mulf %139, %149 : vector<16x64xf32>
    %c0_51 = arith.constant 0 : index
    %c0_52 = arith.constant 0 : index
    %c0_53 = arith.constant 0 : index
    %151 = vector.load %arg12[%c0_51, %c0_52, %c0_53] : memref<2x64x32xf32, #tpu.memory_space<vmem>>, vector<1x64x32xf32>
    %152 = vector.shape_cast %151 : vector<1x64x32xf32> to vector<64x32xf32>
    %cst_54 = arith.constant dense<0.000000e+00> : vector<16x32xf32>
    %153 = tpu.matmul %150, %152, %cst_54 {dimension_numbers = #tpu.dot_dimension_numbers<[1], [0], [0], [1], [0, 0, 1, 1], [], []>} : vector<16x64xf32>, vector<64x32xf32>, vector<16x32xf32> -> vector<16x32xf32>
    %c0_55 = arith.constant 0 : index
    %c0_56 = arith.constant 0 : index
    %c0_57 = arith.constant 0 : index
    %154 = vector.load %arg13[%c0_55, %c0_56, %c0_57] : memref<2x1x32xf32, #tpu.memory_space<vmem>>, vector<1x1x32xf32>
    %155 = vector.shape_cast %154 : vector<1x1x32xf32> to vector<1x32xf32>
    %156 = vector.broadcast %155 : vector<1x32xf32> to vector<16x32xf32>
    %157 = arith.addf %153, %156 : vector<16x32xf32>
    %158 = arith.addf %130, %157 : vector<16x32xf32>
    %c0_58 = arith.constant 0 : index
    %c0_59 = arith.constant 0 : index
    %c0_60 = arith.constant 0 : index
    %159 = vector.load %arg14[%c0_58, %c0_59, %c0_60] : memref<2x1x32xf32, #tpu.memory_space<vmem>>, vector<1x1x32xf32>
    %160 = vector.shape_cast %159 : vector<1x1x32xf32> to vector<1x32xf32>
    %c0_61 = arith.constant 0 : index
    %c0_62 = arith.constant 0 : index
    %c0_63 = arith.constant 0 : index
    %161 = vector.load %arg15[%c0_61, %c0_62, %c0_63] : memref<2x1x32xf32, #tpu.memory_space<vmem>>, vector<1x1x32xf32>
    %162 = vector.shape_cast %161 : vector<1x1x32xf32> to vector<1x32xf32>
    %cst_64 = arith.constant dense<0.000000e+00> : vector<16xf32>
    %163 = vector.multi_reduction <add>, %158, %cst_64 [1] : vector<16x32xf32> to vector<16xf32>
    %164 = vector.shape_cast %163 : vector<16xf32> to vector<16x1xf32>
    %cst_65 = arith.constant 3.200000e+01 : f32
    %165 = vector.broadcast %cst_65 : f32 to vector<16x1xf32>
    %166 = arith.divf %164, %165 : vector<16x1xf32>
    %167 = vector.broadcast %166 : vector<16x1xf32> to vector<16x32xf32>
    %168 = arith.subf %158, %167 : vector<16x32xf32>
    %169 = vector.broadcast %166 : vector<16x1xf32> to vector<16x32xf32>
    %170 = arith.subf %158, %169 : vector<16x32xf32>
    %171 = arith.mulf %168, %170 : vector<16x32xf32>
    %cst_66 = arith.constant dense<0.000000e+00> : vector<16xf32>
    %172 = vector.multi_reduction <add>, %171, %cst_66 [1] : vector<16x32xf32> to vector<16xf32>
    %173 = vector.shape_cast %172 : vector<16xf32> to vector<16x1xf32>
    %cst_67 = arith.constant 3.200000e+01 : f32
    %174 = vector.broadcast %cst_67 : f32 to vector<16x1xf32>
    %175 = arith.divf %173, %174 : vector<16x1xf32>
    %176 = vector.broadcast %166 : vector<16x1xf32> to vector<16x32xf32>
    %177 = arith.subf %158, %176 : vector<16x32xf32>
    %cst_68 = arith.constant 9.99999996E-13 : f32
    %178 = vector.broadcast %cst_68 : f32 to vector<16x1xf32>
    %179 = arith.addf %175, %178 : vector<16x1xf32>
    %180 = math.rsqrt %179 : vector<16x1xf32>
    %181 = vector.broadcast %180 : vector<16x1xf32> to vector<16x32xf32>
    %182 = arith.mulf %177, %181 : vector<16x32xf32>
    %183 = vector.broadcast %160 : vector<1x32xf32> to vector<16x32xf32>
    %184 = arith.mulf %182, %183 : vector<16x32xf32>
    %185 = vector.broadcast %162 : vector<1x32xf32> to vector<16x32xf32>
    %186 = arith.addf %184, %185 : vector<16x32xf32>
    %c1 = arith.constant 1 : index
    %c0_69 = arith.constant 0 : index
    %c0_70 = arith.constant 0 : index
    %187 = vector.load %arg4[%c1, %c0_69, %c0_70] : memref<2x32x96xf32, #tpu.memory_space<vmem>>, vector<1x32x96xf32>
    %188 = vector.shape_cast %187 : vector<1x32x96xf32> to vector<32x96xf32>
    %cst_71 = arith.constant dense<0.000000e+00> : vector<16x96xf32>
    %189 = tpu.matmul %186, %188, %cst_71 {dimension_numbers = #tpu.dot_dimension_numbers<[1], [0], [0], [1], [0, 0, 1, 1], [], []>} : vector<16x32xf32>, vector<32x96xf32>, vector<16x96xf32> -> vector<16x96xf32>
    %c1_72 = arith.constant 1 : index
    %c0_73 = arith.constant 0 : index
    %c0_74 = arith.constant 0 : index
    %190 = vector.load %arg5[%c1_72, %c0_73, %c0_74] : memref<2x1x96xf32, #tpu.memory_space<vmem>>, vector<1x1x96xf32>
    %191 = vector.shape_cast %190 : vector<1x1x96xf32> to vector<1x96xf32>
    %192 = vector.broadcast %191 : vector<1x96xf32> to vector<16x96xf32>
    %193 = arith.addf %189, %192 : vector<16x96xf32>
    %194 = vector.extract_strided_slice %193 {offsets = [0, 0], sizes = [8, 16], strides = [1, 1]} : vector<16x96xf32> to vector<8x16xf32>
    %195 = vector.extract_strided_slice %193 {offsets = [0, 32], sizes = [8, 16], strides = [1, 1]} : vector<16x96xf32> to vector<8x16xf32>
    %196 = vector.extract_strided_slice %193 {offsets = [0, 64], sizes = [8, 16], strides = [1, 1]} : vector<16x96xf32> to vector<8x16xf32>
    %197 = vector.extract_strided_slice %193 {offsets = [0, 16], sizes = [8, 16], strides = [1, 1]} : vector<16x96xf32> to vector<8x16xf32>
    %198 = vector.extract_strided_slice %193 {offsets = [0, 48], sizes = [8, 16], strides = [1, 1]} : vector<16x96xf32> to vector<8x16xf32>
    %199 = vector.extract_strided_slice %193 {offsets = [0, 80], sizes = [8, 16], strides = [1, 1]} : vector<16x96xf32> to vector<8x16xf32>
    %200 = vector.extract_strided_slice %193 {offsets = [8, 0], sizes = [8, 16], strides = [1, 1]} : vector<16x96xf32> to vector<8x16xf32>
    %201 = vector.extract_strided_slice %193 {offsets = [8, 32], sizes = [8, 16], strides = [1, 1]} : vector<16x96xf32> to vector<8x16xf32>
    %202 = vector.extract_strided_slice %193 {offsets = [8, 64], sizes = [8, 16], strides = [1, 1]} : vector<16x96xf32> to vector<8x16xf32>
    %203 = vector.extract_strided_slice %193 {offsets = [8, 16], sizes = [8, 16], strides = [1, 1]} : vector<16x96xf32> to vector<8x16xf32>
    %204 = vector.extract_strided_slice %193 {offsets = [8, 48], sizes = [8, 16], strides = [1, 1]} : vector<16x96xf32> to vector<8x16xf32>
    %205 = vector.extract_strided_slice %193 {offsets = [8, 80], sizes = [8, 16], strides = [1, 1]} : vector<16x96xf32> to vector<8x16xf32>
    %206 = vector.shape_cast %194 : vector<8x16xf32> to vector<1x8x16xf32>
    %207 = vector.shape_cast %197 : vector<8x16xf32> to vector<1x8x16xf32>
    %208 = vector.shape_cast %200 : vector<8x16xf32> to vector<1x8x16xf32>
    %209 = vector.shape_cast %203 : vector<8x16xf32> to vector<1x8x16xf32>
    %210 = tpu.concatenate %206, %207, %208, %209 in 0 : vector<1x8x16xf32>, vector<1x8x16xf32>, vector<1x8x16xf32>, vector<1x8x16xf32> -> vector<4x8x16xf32>
    %211 = vector.shape_cast %195 : vector<8x16xf32> to vector<1x8x16xf32>
    %212 = vector.shape_cast %198 : vector<8x16xf32> to vector<1x8x16xf32>
    %213 = vector.shape_cast %201 : vector<8x16xf32> to vector<1x8x16xf32>
    %214 = vector.shape_cast %204 : vector<8x16xf32> to vector<1x8x16xf32>
    %215 = tpu.concatenate %211, %212, %213, %214 in 0 : vector<1x8x16xf32>, vector<1x8x16xf32>, vector<1x8x16xf32>, vector<1x8x16xf32> -> vector<4x8x16xf32>
    %216 = vector.shape_cast %196 : vector<8x16xf32> to vector<1x8x16xf32>
    %217 = vector.shape_cast %199 : vector<8x16xf32> to vector<1x8x16xf32>
    %218 = vector.shape_cast %202 : vector<8x16xf32> to vector<1x8x16xf32>
    %219 = vector.shape_cast %205 : vector<8x16xf32> to vector<1x8x16xf32>
    %220 = tpu.concatenate %216, %217, %218, %219 in 0 : vector<1x8x16xf32>, vector<1x8x16xf32>, vector<1x8x16xf32>, vector<1x8x16xf32> -> vector<4x8x16xf32>
    "tpu.trace_start"() <{level = 10 : i32, message = "gqd,gkd->gqk"}> : () -> ()
    %cst_75 = arith.constant dense<0.000000e+00> : vector<4x8x8xf32>
    %221 = tpu.matmul %210, %215, %cst_75 {dimension_numbers = #tpu.dot_dimension_numbers<[2], [2], [1], [1], [0, 0, 0, 1, 1, 1], [0], [0]>} : vector<4x8x16xf32>, vector<4x8x16xf32>, vector<4x8x8xf32> -> vector<4x8x8xf32>
    "tpu.trace_stop"() : () -> ()
    %222 = vector.broadcast %36 : vector<4x1x8xf32> to vector<4x8x8xf32>
    %223 = arith.addf %221, %222 : vector<4x8x8xf32>
    %cst_76 = arith.constant dense<0xFF800000> : vector<4x8xf32>
    %224 = vector.multi_reduction <maximumf>, %223, %cst_76 [2] : vector<4x8x8xf32> to vector<4x8xf32>
    %225 = vector.shape_cast %224 : vector<4x8xf32> to vector<4x8x1xf32>
    %226 = vector.broadcast %225 : vector<4x8x1xf32> to vector<4x8x8xf32>
    %227 = arith.subf %223, %226 : vector<4x8x8xf32>
    %228 = math.exp %227 : vector<4x8x8xf32>
    %cst_77 = arith.constant dense<0.000000e+00> : vector<4x8xf32>
    %229 = vector.multi_reduction <add>, %228, %cst_77 [2] : vector<4x8x8xf32> to vector<4x8xf32>
    %230 = vector.shape_cast %229 : vector<4x8xf32> to vector<4x8x1xf32>
    %231 = vector.broadcast %230 : vector<4x8x1xf32> to vector<4x8x8xf32>
    %232 = arith.divf %228, %231 : vector<4x8x8xf32>
    "tpu.trace_start"() <{level = 10 : i32, message = "gqk,gkd->gqd"}> : () -> ()
    %cst_78 = arith.constant dense<0.000000e+00> : vector<4x8x16xf32>
    %233 = tpu.matmul %232, %220, %cst_78 {dimension_numbers = #tpu.dot_dimension_numbers<[2], [1], [1], [2], [0, 0, 0, 1, 1, 2], [0], [0]>} : vector<4x8x8xf32>, vector<4x8x16xf32>, vector<4x8x16xf32> -> vector<4x8x16xf32>
    "tpu.trace_stop"() : () -> ()
    %234 = vector.extract_strided_slice %233 {offsets = [0, 0, 0], sizes = [1, 8, 16], strides = [1, 1, 1]} : vector<4x8x16xf32> to vector<1x8x16xf32>
    %235 = vector.shape_cast %234 : vector<1x8x16xf32> to vector<8x16xf32>
    %236 = vector.extract_strided_slice %233 {offsets = [1, 0, 0], sizes = [1, 8, 16], strides = [1, 1, 1]} : vector<4x8x16xf32> to vector<1x8x16xf32>
    %237 = vector.shape_cast %236 : vector<1x8x16xf32> to vector<8x16xf32>
    %238 = tpu.concatenate %235, %237 in 1 : vector<8x16xf32>, vector<8x16xf32> -> vector<8x32xf32>
    %239 = vector.extract_strided_slice %233 {offsets = [2, 0, 0], sizes = [1, 8, 16], strides = [1, 1, 1]} : vector<4x8x16xf32> to vector<1x8x16xf32>
    %240 = vector.shape_cast %239 : vector<1x8x16xf32> to vector<8x16xf32>
    %241 = vector.extract_strided_slice %233 {offsets = [3, 0, 0], sizes = [1, 8, 16], strides = [1, 1, 1]} : vector<4x8x16xf32> to vector<1x8x16xf32>
    %242 = vector.shape_cast %241 : vector<1x8x16xf32> to vector<8x16xf32>
    %243 = tpu.concatenate %240, %242 in 1 : vector<8x16xf32>, vector<8x16xf32> -> vector<8x32xf32>
    %244 = tpu.concatenate %238, %243 in 0 : vector<8x32xf32>, vector<8x32xf32> -> vector<16x32xf32>
    %c1_79 = arith.constant 1 : index
    %c0_80 = arith.constant 0 : index
    %c0_81 = arith.constant 0 : index
    %245 = vector.load %arg6[%c1_79, %c0_80, %c0_81] : memref<2x32x32xf32, #tpu.memory_space<vmem>>, vector<1x32x32xf32>
    %246 = vector.shape_cast %245 : vector<1x32x32xf32> to vector<32x32xf32>
    %cst_82 = arith.constant dense<0.000000e+00> : vector<16x32xf32>
    %247 = tpu.matmul %244, %246, %cst_82 {dimension_numbers = #tpu.dot_dimension_numbers<[1], [0], [0], [1], [0, 0, 1, 1], [], []>} : vector<16x32xf32>, vector<32x32xf32>, vector<16x32xf32> -> vector<16x32xf32>
    %c1_83 = arith.constant 1 : index
    %c0_84 = arith.constant 0 : index
    %c0_85 = arith.constant 0 : index
    %248 = vector.load %arg7[%c1_83, %c0_84, %c0_85] : memref<2x1x32xf32, #tpu.memory_space<vmem>>, vector<1x1x32xf32>
    %249 = vector.shape_cast %248 : vector<1x1x32xf32> to vector<1x32xf32>
    %250 = vector.broadcast %249 : vector<1x32xf32> to vector<16x32xf32>
    %251 = arith.addf %247, %250 : vector<16x32xf32>
    %252 = arith.addf %186, %251 : vector<16x32xf32>
    %c1_86 = arith.constant 1 : index
    %c0_87 = arith.constant 0 : index
    %c0_88 = arith.constant 0 : index
    %253 = vector.load %arg8[%c1_86, %c0_87, %c0_88] : memref<2x1x32xf32, #tpu.memory_space<vmem>>, vector<1x1x32xf32>
    %254 = vector.shape_cast %253 : vector<1x1x32xf32> to vector<1x32xf32>
    %c1_89 = arith.constant 1 : index
    %c0_90 = arith.constant 0 : index
    %c0_91 = arith.constant 0 : index
    %255 = vector.load %arg9[%c1_89, %c0_90, %c0_91] : memref<2x1x32xf32, #tpu.memory_space<vmem>>, vector<1x1x32xf32>
    %256 = vector.shape_cast %255 : vector<1x1x32xf32> to vector<1x32xf32>
    %cst_92 = arith.constant dense<0.000000e+00> : vector<16xf32>
    %257 = vector.multi_reduction <add>, %252, %cst_92 [1] : vector<16x32xf32> to vector<16xf32>
    %258 = vector.shape_cast %257 : vector<16xf32> to vector<16x1xf32>
    %cst_93 = arith.constant 3.200000e+01 : f32
    %259 = vector.broadcast %cst_93 : f32 to vector<16x1xf32>
    %260 = arith.divf %258, %259 : vector<16x1xf32>
    %261 = vector.broadcast %260 : vector<16x1xf32> to vector<16x32xf32>
    %262 = arith.subf %252, %261 : vector<16x32xf32>
    %263 = vector.broadcast %260 : vector<16x1xf32> to vector<16x32xf32>
    %264 = arith.subf %252, %263 : vector<16x32xf32>
    %265 = arith.mulf %262, %264 : vector<16x32xf32>
    %cst_94 = arith.constant dense<0.000000e+00> : vector<16xf32>
    %266 = vector.multi_reduction <add>, %265, %cst_94 [1] : vector<16x32xf32> to vector<16xf32>
    %267 = vector.shape_cast %266 : vector<16xf32> to vector<16x1xf32>
    %cst_95 = arith.constant 3.200000e+01 : f32
    %268 = vector.broadcast %cst_95 : f32 to vector<16x1xf32>
    %269 = arith.divf %267, %268 : vector<16x1xf32>
    %270 = vector.broadcast %260 : vector<16x1xf32> to vector<16x32xf32>
    %271 = arith.subf %252, %270 : vector<16x32xf32>
    %cst_96 = arith.constant 9.99999996E-13 : f32
    %272 = vector.broadcast %cst_96 : f32 to vector<16x1xf32>
    %273 = arith.addf %269, %272 : vector<16x1xf32>
    %274 = math.rsqrt %273 : vector<16x1xf32>
    %275 = vector.broadcast %274 : vector<16x1xf32> to vector<16x32xf32>
    %276 = arith.mulf %271, %275 : vector<16x32xf32>
    %277 = vector.broadcast %254 : vector<1x32xf32> to vector<16x32xf32>
    %278 = arith.mulf %276, %277 : vector<16x32xf32>
    %279 = vector.broadcast %256 : vector<1x32xf32> to vector<16x32xf32>
    %280 = arith.addf %278, %279 : vector<16x32xf32>
    %c1_97 = arith.constant 1 : index
    %c0_98 = arith.constant 0 : index
    %c0_99 = arith.constant 0 : index
    %281 = vector.load %arg10[%c1_97, %c0_98, %c0_99] : memref<2x32x64xf32, #tpu.memory_space<vmem>>, vector<1x32x64xf32>
    %282 = vector.shape_cast %281 : vector<1x32x64xf32> to vector<32x64xf32>
    %cst_100 = arith.constant dense<0.000000e+00> : vector<16x64xf32>
    %283 = tpu.matmul %280, %282, %cst_100 {dimension_numbers = #tpu.dot_dimension_numbers<[1], [0], [0], [1], [0, 0, 1, 1], [], []>} : vector<16x32xf32>, vector<32x64xf32>, vector<16x64xf32> -> vector<16x64xf32>
    %c1_101 = arith.constant 1 : index
    %c0_102 = arith.constant 0 : index
    %c0_103 = arith.constant 0 : index
    %284 = vector.load %arg11[%c1_101, %c0_102, %c0_103] : memref<2x1x64xf32, #tpu.memory_space<vmem>>, vector<1x1x64xf32>
    %285 = vector.shape_cast %284 : vector<1x1x64xf32> to vector<1x64xf32>
    %286 = vector.broadcast %285 : vector<1x64xf32> to vector<16x64xf32>
    %287 = arith.addf %283, %286 : vector<16x64xf32>
    %cst_104 = arith.constant 5.000000e-01 : f32
    %288 = vector.broadcast %cst_104 : f32 to vector<16x64xf32>
    %289 = arith.mulf %288, %287 : vector<16x64xf32>
    %cst_105 = arith.constant 4.471500e-02 : f32
    %290 = vector.broadcast %cst_105 : f32 to vector<16x64xf32>
    %291 = arith.mulf %290, %287 : vector<16x64xf32>
    %292 = arith.mulf %291, %287 : vector<16x64xf32>
    %293 = arith.mulf %292, %287 : vector<16x64xf32>
    %294 = arith.addf %287, %293 : vector<16x64xf32>
    %cst_106 = arith.constant 0.797884583 : f32
    %295 = vector.broadcast %cst_106 : f32 to vector<16x64xf32>
    %296 = arith.mulf %295, %294 : vector<16x64xf32>
    %297 = math.tanh %296 : vector<16x64xf32>
    %cst_107 = arith.constant 1.000000e+00 : f32
    %298 = vector.broadcast %cst_107 : f32 to vector<16x64xf32>
    %299 = arith.addf %298, %297 : vector<16x64xf32>
    %300 = arith.mulf %289, %299 : vector<16x64xf32>
    %c1_108 = arith.constant 1 : index
    %c0_109 = arith.constant 0 : index
    %c0_110 = arith.constant 0 : index
    %301 = vector.load %arg12[%c1_108, %c0_109, %c0_110] : memref<2x64x32xf32, #tpu.memory_space<vmem>>, vector<1x64x32xf32>
    %302 = vector.shape_cast %301 : vector<1x64x32xf32> to vector<64x32xf32>
    %cst_111 = arith.constant dense<0.000000e+00> : vector<16x32xf32>
    %303 = tpu.matmul %300, %302, %cst_111 {dimension_numbers = #tpu.dot_dimension_numbers<[1], [0], [0], [1], [0, 0, 1, 1], [], []>} : vector<16x64xf32>, vector<64x32xf32>, vector<16x32xf32> -> vector<16x32xf32>
    %c1_112 = arith.constant 1 : index
    %c0_113 = arith.constant 0 : index
    %c0_114 = arith.constant 0 : index
    %304 = vector.load %arg13[%c1_112, %c0_113, %c0_114] : memref<2x1x32xf32, #tpu.memory_space<vmem>>, vector<1x1x32xf32>
    %305 = vector.shape_cast %304 : vector<1x1x32xf32> to vector<1x32xf32>
    %306 = vector.broadcast %305 : vector<1x32xf32> to vector<16x32xf32>
    %307 = arith.addf %303, %306 : vector<16x32xf32>
    %308 = arith.addf %280, %307 : vector<16x32xf32>
    %c1_115 = arith.constant 1 : index
    %c0_116 = arith.constant 0 : index
    %c0_117 = arith.constant 0 : index
    %309 = vector.load %arg14[%c1_115, %c0_116, %c0_117] : memref<2x1x32xf32, #tpu.memory_space<vmem>>, vector<1x1x32xf32>
    %310 = vector.shape_cast %309 : vector<1x1x32xf32> to vector<1x32xf32>
    %c1_118 = arith.constant 1 : index
    %c0_119 = arith.constant 0 : index
    %c0_120 = arith.constant 0 : index
    %311 = vector.load %arg15[%c1_118, %c0_119, %c0_120] : memref<2x1x32xf32, #tpu.memory_space<vmem>>, vector<1x1x32xf32>
    %312 = vector.shape_cast %311 : vector<1x1x32xf32> to vector<1x32xf32>
    %cst_121 = arith.constant dense<0.000000e+00> : vector<16xf32>
    %313 = vector.multi_reduction <add>, %308, %cst_121 [1] : vector<16x32xf32> to vector<16xf32>
    %314 = vector.shape_cast %313 : vector<16xf32> to vector<16x1xf32>
    %cst_122 = arith.constant 3.200000e+01 : f32
    %315 = vector.broadcast %cst_122 : f32 to vector<16x1xf32>
    %316 = arith.divf %314, %315 : vector<16x1xf32>
    %317 = vector.broadcast %316 : vector<16x1xf32> to vector<16x32xf32>
    %318 = arith.subf %308, %317 : vector<16x32xf32>
    %319 = vector.broadcast %316 : vector<16x1xf32> to vector<16x32xf32>
    %320 = arith.subf %308, %319 : vector<16x32xf32>
    %321 = arith.mulf %318, %320 : vector<16x32xf32>
    %cst_123 = arith.constant dense<0.000000e+00> : vector<16xf32>
    %322 = vector.multi_reduction <add>, %321, %cst_123 [1] : vector<16x32xf32> to vector<16xf32>
    %323 = vector.shape_cast %322 : vector<16xf32> to vector<16x1xf32>
    %cst_124 = arith.constant 3.200000e+01 : f32
    %324 = vector.broadcast %cst_124 : f32 to vector<16x1xf32>
    %325 = arith.divf %323, %324 : vector<16x1xf32>
    %326 = vector.broadcast %316 : vector<16x1xf32> to vector<16x32xf32>
    %327 = arith.subf %308, %326 : vector<16x32xf32>
    %cst_125 = arith.constant 9.99999996E-13 : f32
    %328 = vector.broadcast %cst_125 : f32 to vector<16x1xf32>
    %329 = arith.addf %325, %328 : vector<16x1xf32>
    %330 = math.rsqrt %329 : vector<16x1xf32>
    %331 = vector.broadcast %330 : vector<16x1xf32> to vector<16x32xf32>
    %332 = arith.mulf %327, %331 : vector<16x32xf32>
    %333 = vector.broadcast %310 : vector<1x32xf32> to vector<16x32xf32>
    %334 = arith.mulf %332, %333 : vector<16x32xf32>
    %335 = vector.broadcast %312 : vector<1x32xf32> to vector<16x32xf32>
    %336 = arith.addf %334, %335 : vector<16x32xf32>
    %337 = vector.extract_strided_slice %336 {offsets = [0, 0], sizes = [1, 32], strides = [1, 1]} : vector<16x32xf32> to vector<1x32xf32>
    %338 = vector.extract_strided_slice %336 {offsets = [8, 0], sizes = [1, 32], strides = [1, 1]} : vector<16x32xf32> to vector<1x32xf32>
    %339 = tpu.concatenate %337, %338 in 0 : vector<1x32xf32>, vector<1x32xf32> -> vector<2x32xf32>
    %c0_126 = arith.constant 0 : index
    %c0_127 = arith.constant 0 : index
    %340 = vector.load %arg16[%c0_126, %c0_127] : memref<32x32xf32, #tpu.memory_space<vmem>>, vector<32x32xf32>
    %cst_128 = arith.constant dense<0.000000e+00> : vector<2x32xf32>
    %341 = tpu.matmul %339, %340, %cst_128 {dimension_numbers = #tpu.dot_dimension_numbers<[1], [0], [0], [1], [0, 0, 1, 1], [], []>} : vector<2x32xf32>, vector<32x32xf32>, vector<2x32xf32> -> vector<2x32xf32>
    %c0_129 = arith.constant 0 : index
    %c0_130 = arith.constant 0 : index
    %342 = vector.load %arg17[%c0_129, %c0_130] : memref<1x32xf32, #tpu.memory_space<vmem>>, vector<1x32xf32>
    %343 = vector.broadcast %342 : vector<1x32xf32> to vector<2x32xf32>
    %344 = arith.addf %341, %343 : vector<2x32xf32>
    %345 = math.tanh %344 : vector<2x32xf32>
    %c0_131 = arith.constant 0 : index
    %c0_132 = arith.constant 0 : index
    %346 = vector.load %arg18[%c0_131, %c0_132] : memref<32x3xf32, #tpu.memory_space<vmem>>, vector<32x3xf32>
    %cst_133 = arith.constant dense<0.000000e+00> : vector<2x3xf32>
    %347 = tpu.matmul %345, %346, %cst_133 {dimension_numbers = #tpu.dot_dimension_numbers<[1], [0], [0], [1], [0, 0, 1, 1], [], []>} : vector<2x32xf32>, vector<32x3xf32>, vector<2x3xf32> -> vector<2x3xf32>
    %c0_134 = arith.constant 0 : index
    %c0_135 = arith.constant 0 : index
    %348 = vector.load %arg19[%c0_134, %c0_135] : memref<1x3xf32, #tpu.memory_space<vmem>>, vector<1x3xf32>
    %349 = vector.broadcast %348 : vector<1x3xf32> to vector<2x3xf32>
    %350 = arith.addf %347, %349 : vector<2x3xf32>
    %c0_136 = arith.constant 0 : index
    %c0_137 = arith.constant 0 : index
    %351 = vector.load %arg20[%c0_136, %c0_137] : memref<2x3xf32, #tpu.memory_space<vmem>>, vector<2x3xf32>
    tpu.vector_store %arg20[%c0_136, %c0_137], %350 {strides = array<i32>} : memref<2x3xf32, #tpu.memory_space<vmem>>, vector<2x3xf32>,
    return
  }
}

</mosaic_0001>

<bundles_post_ra>
// kernel: bert_nli_forward.1
= control target key start
LH: loop header
LB: loop body
LE: loop exit
PB: predicated region body
PF: predicated region fallthrough
CT: control target
= control target key end

     0   :  { %s3769_s0 = inlined_call_operand.vmem [shape: f32[16,32], index: 0, kind: input, shape index: {}]   ;;  %s3770_s1 = inlined_call_operand.vmem [shape: f32[2,8], index: 1, kind: input, shape index: {}]   ;;  %s3771_s2 = inlined_call_operand.vmem [shape: f32[1,32], index: 2, kind: input, shape index: {}]   ;;  %s3772_s3 = inlined_call_operand.vmem [shape: f32[1,32], index: 3, kind: input, shape index: {}]   ;;  %s3773_s4 = inlined_call_operand.vmem [shape: f32[2,32,96], index: 4, kind: input, shape index: {}]   ;;  %s3774_s5 = inlined_call_operand.vmem [shape: f32[2,1,96], index: 5, kind: input, shape index: {}]   ;;  %s3775_s6 = inlined_call_operand.vmem [shape: f32[2,32,32], index: 6, kind: input, shape index: {}]   ;;  %s3776_s7 = inlined_call_operand.vmem [shape: f32[2,1,32], index: 7, kind: input, shape index: {}]   ;;  %s3777_s8 = inlined_call_operand.vmem [shape: f32[2,1,32], index: 8, kind: input, shape index: {}]   ;;  %s3778_s9 = inlined_call_operand.vmem [shape: f32[2,1,32], index: 9, kind: input, shape index: {}]   ;;  %s3779_s10 = inlined_call_operand.vmem [shape: f32[2,32,64], index: 10, kind: input, shape index: {}]   ;;  %s3780_s11 = inlined_call_operand.vmem [shape: f32[2,1,64], index: 11, kind: input, shape index: {}]   ;;  %s3781_s12 = inlined_call_operand.vmem [shape: f32[2,64,32], index: 12, kind: input, shape index: {}]   ;;  %s3782_s13 = inlined_call_operand.vmem [shape: f32[2,1,32], index: 13, kind: input, shape index: {}]   ;;  %s3783_s14 = inlined_call_operand.vmem [shape: f32[2,1,32], index: 14, kind: input, shape index: {}]   ;;  %s3784_s15 = inlined_call_operand.vmem [shape: f32[2,1,32], index: 15, kind: input, shape index: {}]   ;;  %s3785_s16 = inlined_call_operand.vmem [shape: f32[32,32], index: 16, kind: input, shape index: {}]   ;;  %s3786_s17 = inlined_call_operand.vmem [shape: f32[1,32], index: 17, kind: input, shape index: {}]   ;;  %s3787_s18 = inlined_call_operand.vmem [shape: f32[32,3], index: 18, kind: input, shape index: {}]   ;;  %s3788_s19 = inlined_call_operand.vmem [shape: f32[1,3], index: 19, kind: input, shape index: {}]   ;;  %s3789_s20 = inlined_call_operand.hbm [shape: f32[2,3], index: 20, kind: output, shape index: {}]  }
   0x1   :  { %3792 = sst [smem:[#allocation5_spill]] %s3769_s0 }
   0x2   :  { %3793 = sst [smem:[#allocation6_spill]] %s3770_s1 }
   0x3   :  { %3794 = sst [smem:[#allocation7_spill]] %s3771_s2 }
   0x4   :  { %3795 = sst [smem:[#allocation8_spill]] %s3772_s3 }
   0x5   :  { %3796 = sst [smem:[#allocation9_spill]] %s3773_s4 }
   0x6   :  { %s3797_s23 = sld [smem:[#allocation5_spill]]  ;;  %vm70_vm0 = vcmask 261120  }
   0xc   :  { %v66_v0 = vld [vmem:[%s3797_s23] sm:$0xff]  ;;  %v67_v1 = vld [vmem:[%s3797_s23 + $0x8] sm:$0xff] }
   0xd   :  { %25 = vsyncpa [#allocation3], 0  ;;  %v71_v2 = vsel %vm70_vm0, %v66_v0, 0.0  ;;  %v74_v3 = vsel %vm70_vm0, %v67_v1, 0.0  ;;  %s3798_s26 = sld [smem:[#allocation9_spill]]  ;;  %s3799_s22 = sld [smem:[#allocation7_spill]]  ;;  %v216_v50 = vlaneseq }
   0xe   :  { %72 = vadd.xlane.f32.xlu0 %v71_v2  ;;  %s3800_s2 = sld [smem:[#allocation8_spill]]  ;;  %v3211_v36 = vmov 0.0   ;;  %vm3212_vm1 = vmmov 0   ;;  %v2633_v37 = vld [vmem:[%s3774_s5] ss:$0 sm:$0xff]  ;;  %s3213_s27 = smov 112  }
   0xf   :  { %2830 = vmatprep.subr.mxu1 %v3211_v36  ;;  %2832 = vmatprep.mubr.msk.f32.mxu1 %vm3212_vm1, %v3211_v36  ;;  %s3214_s28 = smov 96   ;;  %vm226_vm2 = vcmask 130048   ;;  %v217_v51 = vshrl.u32 %v216_v50, 7  ;;  %s3801_s30 = sld [smem:[#allocation6_spill]]  ;;  %vm529_vm3 = vcmask 64512   ;;  %v891_v50 = vld [vmem:[%s3775_s6 + $0x18] sm:$0xff] }
  0x10   :  { %s3215_s0 = smov 64   ;;  %s3216_s4 = smov 16   ;;  %vm1151_vm4 = vcmask 523264   ;;  %vm2444_vm5 = vcmask 1040384   ;;  %vm2615_vm6 = vcmask 17408  }
  0x11   :  { %v218_v52 = vsub.s32 0, %v217_v51 }
  0x12   :  { %75 = vadd.xlane.f32.xlu0 %v74_v3 }
  0x13   :  { %v118_v14 = vld [vmem:[%s3798_s26] sm:$0xff]  ;;  %v119_v15 = vld [vmem:[%s3798_s26 + $0x8] sm:$0xff]  ;;  %v120_v16 = vld [vmem:[%s3798_s26 + $0x10] sm:$0xff] }
  0x14   :  { %v3025_v17 = vpack.c.bf16 %v119_v15, %v118_v14  ;;  %v121_v18 = vld [vmem:[%s3798_s26 + $0x18] sm:$0xff]  ;;  %v2631_v27 = vld [vmem:[%s3799_s22] ss:$0 sm:$0xff] }
  0x15   :  { %v3029_v19 = vpack.c.bf16 %v121_v18, %v120_v16  ;;  %v2632_v29 = vld [vmem:[%s3800_s2] ss:$0 sm:$0xff] }
  0x16   :  { %3026 = vmatprep.subr.bf16.mxu0 %v3025_v17  ;;  %v114_v53 = vld [vmem:[%s3801_s30] sm:$0x3] }
  0x17   :  { %3028 = vmatpush3.bf16.msra.mxu0 %v3025_v17  ;;  %v116_v54 = vrot.slane %v114_v53, 1  ;;  %v3416_v55 = vrot.slane %v114_v53, %v218_v52 }
  0x18   :  { %3030 = vmatprep.subr.bf16.mxu0 %v3029_v19 }
  0x19   :  { %v3419_v59 = vrot.slane %v116_v54, %v218_v52 }
  0x1b   :  { %3032 = vmatpush3.bf16.msra.mxu0 %v3029_v19 }
  0x1c   :  { %2840 = vmatprep.subr.mxu0 %v3211_v36 }
  0x9b   :  { %v73_v4 = vpop.xlane.xlu0 %72 }
  0x9c   :  { %v78_v5 = vmul.f32 0.03125, %v73_v4 }
  0x9e   :  { %v80_v6 = vsub.f32 %v66_v0, %v78_v5 }
  0x9f   :  { %v76_v7 = vpop.xlane.xlu0 %75 }
  0xa0   :  { %v79_v8 = vmul.f32 0.03125, %v76_v7  ;;  %v82_v9 = vmul.f32 %v80_v6, %v80_v6 }
  0xa2   :  { %v81_v10 = vsub.f32 %v67_v1, %v79_v8  ;;  %v84_v11 = vsel %vm70_vm0, %v82_v9, 0.0 }
  0xa3   :  { %85 = vadd.xlane.f32.xlu1 %v84_v11 }
  0xa4   :  { %v83_v12 = vmul.f32 %v81_v10, %v81_v10 }
  0xa6   :  { %v87_v13 = vsel %vm70_vm0, %v83_v12, 0.0 }
  0xa7   :  { %88 = vadd.xlane.f32.xlu1 %v87_v13 }
 0x130   :  { %v86_v20 = vpop.xlane.xlu1 %85 }
 0x131   :  { %v90_v21 = vmul.f32 0.03125, %v86_v20 }
 0x133   :  { %v92_v22 = vadd.f32 1e-12, %v90_v21 }
 0x134   :  { %v89_v23 = vpop.xlane.xlu1 %88 }
 0x135   :  { %3125 = vrsqrt.f32 %v92_v22  ;;  %v91_v24 = vmul.f32 0.03125, %v89_v23 }
 0x137   :  { %v93_v25 = vadd.f32 1e-12, %v91_v24 }
 0x139   :  { %3127 = vrsqrt.f32 %v93_v25 }
 0x13f   :  { %v3126_v26 = vpop.eup %3125 }
 0x140   :  { %v96_v28 = vmul.f32 %v3126_v26, %v80_v6 }
 0x142   :  { %v104_v30 = vmul.f32 %v2631_v27, %v96_v28 }
 0x143   :  { %v3128_v31 = vpop.eup %3127 }
 0x144   :  { %v97_v32 = vmul.f32 %v3128_v31, %v81_v10  ;;  %v3352_v33 = vadd.f32 %v2632_v29, %v104_v30 }
 0x146   :  { %v105_v34 = vmul.f32 %v2631_v27, %v97_v32  ;;  %2827 = vmatprep.mubr.msk.f32.mxu0 %vm70_vm0, %v3352_v33 }
 0x148   :  { %v3356_v35 = vadd.f32 %v2632_v29, %v105_v34 }
 0x14a   :  { %2828 = vmatmul.mubr.msk.f32.vlgmr.msra.gmra.mrb[0].mxu0 %vm70_vm0, %v3356_v35 }
 0x14b   :  { %2842 = vmatprep.mubr.msk.f32.mxu0 %vm3212_vm1, %v3211_v36 }
 0x21d   :  { %v2829_v38 = vpop.f32.mrb[0].mxu0 }
 0x21e   :  { %v3369_v39 = vadd.f32 %v2829_v38, %v2633_v37  ;;  %v201_v40 = vpop.f32.mrb[1].mxu0 }
 0x21f   :  { %v3371_v41 = vadd.f32 %v2633_v37, %v201_v40 }
 0x220   :  { %214 = vrot.lane.b32.xlu1 %v3369_v39, %s3213_s27 }
 0x221   :  { %211 = vrot.lane.b32.xlu0 %v3371_v41, %s3213_s27 }
 0x224   :  { %224 = vrot.lane.b32.xlu1 %v3371_v41, %s3214_s28 }
 0x292   :  { %v3379_v42 = vpop.permute.xlu1 %214 }
 0x293   :  { %453 = vrot.lane.b32.xlu0 %v3379_v42, %s3214_s28  ;;  %v3383_v43 = vpop.permute.xlu0 %211 }
 0x294   :  { %301 = vrot.lane.b32.xlu1 %v3383_v43, %s3214_s28 }
 0x296   :  { %v225_v44 = vpop.permute.xlu1 %224 }
 0x297   :  { %2831 = vmatpush3.xpose.msk.msra.mxu1 %vm226_vm2, %v225_v44 }
 0x298   :  { %377 = vrot.lane.b32.xlu1 %v3369_v39, %s3214_s28  ;;  %2835 = vmatprep.subr.mxu1 %v3211_v36 }
 0x29a   :  { %2833 = vmatmul.mubr.msk.f32.vlgmr.msra.gmra.mrb[0].mxu1 %vm226_vm2, %v3371_v41 }
 0x29b   :  { %2837 = vmatprep.mubr.msk.f32.mxu1 %vm3212_vm1, %v3211_v36 }
 0x305   :  { %v454_v46 = vpop.permute.xlu0 %453 }
 0x306   :  { %v302_v45 = vpop.permute.xlu1 %301 }
 0x307   :  { %2836 = vmatpush3.xpose.msk.msra.mxu1 %vm226_vm2, %v302_v45 }
 0x308   :  { %2845 = vmatprep.subr.mxu1 %v3211_v36 }
 0x30a   :  { %2838 = vmatmul.mubr.msk.f32.vlgmr.msra.gmra.mrb[2].mxu1 %vm226_vm2, %v3383_v43  ;;  %v378_v47 = vpop.permute.xlu1 %377 }
 0x30b   :  { %2841 = vmatpush3.xpose.msk.msra.mxu0 %vm226_vm2, %v378_v47  ;;  %2846 = vmatpush3.xpose.msk.msra.mxu1 %vm226_vm2, %v454_v46  ;;  %v888_v46 = vld [vmem:[%s3775_s6] sm:$0xff]  ;;  %v889_v47 = vld [vmem:[%s3775_s6 + $0x8] sm:$0xff] }
 0x30c   :  { %2847 = vmatprep.mubr.msk.f32.mxu1 %vm3212_vm1, %v3211_v36  ;;  %2855 = vmatprep.subr.mxu1 %v3211_v36 }
 0x30d   :  { %2850 = vmatprep.subr.mxu0 %v3211_v36 }
 0x30e   :  { %2843 = vmatmul.mubr.msk.f32.vlgmr.msra.gmra.mrb[2].mxu0 %vm226_vm2, %v3369_v39  ;;  %2848 = vmatmul.mubr.msk.f32.vlgmr.msra.gmra.mrb[4].mxu1 %vm226_vm2, %v3379_v42 }
 0x30f   :  { %2857 = vmatprep.mubr.msk.f32.mxu1 %vm3212_vm1, %v3211_v36  ;;  %2852 = vmatprep.mubr.msk.f32.mxu0 %vm3212_vm1, %v3211_v36 }
 0x36d   :  { %v297_v48 = vpop.f32.mrb[0].mxu1 }
 0x36e   :  { %v2834_v49 = vpop.f32.mrb[1].mxu1  ;;  %v298_v60 = vadd.f32 %v297_v48, %v3416_v55  ;;  %v3033_v48 = vpack.c.bf16 %v889_v47, %v888_v46  ;;  %v1138_v47 = vld [vmem:[%s3781_s12 + $0x10] sm:$0xff] }
 0x36f   :  { %v890_v49 = vld [vmem:[%s3775_s6 + $0x10] sm:$0xff] }
 0x370   :  { %v530_v4 = vsel %vm529_vm3, %v298_v60, -inf  ;;  %v3037_v51 = vpack.c.bf16 %v891_v50, %v890_v49  ;;  %v1140_v50 = vld [vmem:[%s3781_s12 + $0x20] sm:$0xff] }
 0x3dd   :  { %v373_v56 = vpop.f32.mrb[2].mxu1 }
 0x3de   :  { %v374_v57 = vadd.f32 %v373_v56, %v3416_v55  ;;  %v2839_v58 = vpop.f32.mrb[3].mxu1 }
 0x3e0   :  { %v533_v61 = vsel %vm529_vm3, %v374_v57, -inf }
 0x3e1   :  { %534 = vmax.xlane.f32.xlu0 %v533_v61  ;;  %v449_v62 = vpop.f32.mrb[2].mxu0  ;;  %v525_v63 = vpop.f32.mrb[4].mxu1 }
 0x3e2   :  { %v526_v0 = vadd.f32 %v525_v63, %v3419_v59  ;;  %v2844_v1 = vpop.f32.mrb[3].mxu0  ;;  %v2849_v2 = vpop.f32.mrb[5].mxu1  ;;  %v450_v3 = vadd.f32 %v449_v62, %v3419_v59 }
 0x3e3   :  { %v2648_v2 = vld [vmem:[%s3776_s7] ss:$0 sm:$0xff] }
 0x3e4   :  { %v539_v5 = vsel %vm529_vm3, %v526_v0, -inf  ;;  %v536_v6 = vsel %vm529_vm3, %v450_v3, -inf }
 0x3e5   :  { %531 = vmax.xlane.f32.xlu0 %v530_v4  ;;  %540 = vmax.xlane.f32.xlu1 %v539_v5 }
 0x3e9   :  { %537 = vmax.xlane.f32.xlu0 %v536_v6 }
 0x46e   :  { %v535_v7 = vpop.xlane.xlu0 %534 }
 0x46f   :  { %v543_v8 = vsub.f32 %v374_v57, %v535_v7 }
 0x471   :  { %v548_v9 = vmul.f32 1.442695, %v543_v8 }
 0x472   :  { %v541_v10 = vpop.xlane.xlu1 %540  ;;  %v532_v17 = vpop.xlane.xlu0 %531 }
 0x473   :  { %3129 = vpow2.f32 %v548_v9  ;;  %v545_v11 = vsub.f32 %v526_v0, %v541_v10  ;;  %v542_v21 = vsub.f32 %v298_v60, %v532_v17 }
 0x475   :  { %v552_v12 = vmul.f32 1.442695, %v545_v11  ;;  %v546_v22 = vmul.f32 1.442695, %v542_v21 }
 0x476   :  { %v538_v18 = vpop.xlane.xlu0 %537 }
 0x477   :  { %3131 = vpow2.f32 %v552_v12  ;;  %v544_v19 = vsub.f32 %v450_v3, %v538_v18 }
 0x479   :  { %v550_v20 = vmul.f32 1.442695, %v544_v19 }
 0x47b   :  { %3133 = vpow2.f32 %v550_v20  ;;  %v1027_v20 = vld [vmem:[%s3779_s10 + $0x8] sm:$0xff] }
 0x47c   :  { %3135 = vpow2.f32 %v546_v22  ;;  %v1028_v22 = vld [vmem:[%s3779_s10 + $0x10] sm:$0xff] }
 0x47d   :  { %v3130_v13 = vpop.eup %3129 }
 0x47e   :  { %v557_v14 = vsel %vm529_vm3, %v3130_v13, 0.0 }
 0x47f   :  { %558 = vadd.xlane.f32.xlu0 %v557_v14 }
 0x481   :  { %v3132_v15 = vpop.eup %3131 }
 0x482   :  { %v563_v16 = vsel %vm529_vm3, %v3132_v15, 0.0 }
 0x483   :  { %564 = vadd.xlane.f32.xlu1 %v563_v16 }
 0x485   :  { %v3134_v23 = vpop.eup %3133 }
 0x486   :  { %v560_v24 = vsel %vm529_vm3, %v3134_v23, 0.0  ;;  %v3136_v25 = vpop.eup %3135 }
 0x487   :  { %v554_v26 = vsel %vm529_vm3, %v3136_v25, 0.0 }
 0x494   :  { %802 = vrot.lane.b32.xlu1 %v3379_v42, %s3215_s0 }
 0x495   :  { %650 = vrot.lane.b32.xlu0 %v3383_v43, %s3215_s0 }
 0x4b4   :  { %561 = vadd.xlane.f32.xlu0 %v560_v24 }
 0x4b8   :  { %555 = vadd.xlane.f32.xlu1 %v554_v26 }
 0x4c9   :  { %726 = vrot.lane.b32.xlu1 %v3369_v39, %s3215_s0 }
 0x4ca   :  { %574 = vrot.lane.b32.xlu0 %v3371_v41, %s3215_s0 }
 0x50c   :  { %v559_v27 = vpop.xlane.xlu0 %558 }
 0x50d   :  { %3137 = vrcp.f32 %v559_v27 }
 0x510   :  { %v651_v28 = vpop.permute.xlu0 %650  ;;  %v565_v29 = vpop.xlane.xlu1 %564 }
 0x511   :  { %2856 = vmatpush3.msra.mxu1 %v651_v28  ;;  %3139 = vrcp.f32 %v565_v29 }
 0x512   :  { %2865 = vmatprep.subr.mxu1 %v3211_v36 }
 0x514   :  { %v803_v32 = vpop.permute.xlu1 %802 }
 0x517   :  { %v3138_v30 = vpop.eup %3137 }
 0x518   :  { %v569_v31 = vmul.f32 %v3138_v30, %v3130_v13 }
 0x51a   :  { %2858 = vmatmul.mubr.msk.f32.vlgmr.msra.gmra.mrb[6].mxu1 %vm529_vm3, %v569_v31 }
 0x51b   :  { %2866 = vmatpush3.msra.mxu1 %v803_v32  ;;  %2867 = vmatprep.mubr.msk.f32.mxu1 %vm3212_vm1, %v3211_v36  ;;  %v3140_v34 = vpop.eup %3139  ;;  %v2651_v32 = vld [vmem:[%s3777_s8] ss:$0 sm:$0xff] }
 0x51c   :  { %v573_v37 = vmul.f32 %v3140_v34, %v3132_v15 }
 0x51e   :  { %2868 = vmatmul.mubr.msk.f32.vlgmr.msra.gmra.mrb[8].mxu1 %vm529_vm3, %v573_v37  ;;  %v2652_v37 = vld [vmem:[%s3778_s9] ss:$0 sm:$0xff] }
 0x541   :  { %v562_v38 = vpop.xlane.xlu0 %561 }
 0x545   :  { %v575_v39 = vpop.permute.xlu0 %574  ;;  %v556_v40 = vpop.xlane.xlu1 %555 }
 0x546   :  { %2851 = vmatpush3.msra.mxu0 %v575_v39  ;;  %3141 = vrcp.f32 %v556_v40 }
 0x547   :  { %2860 = vmatprep.subr.mxu0 %v3211_v36  ;;  %3143 = vrcp.f32 %v562_v38 }
 0x549   :  { %v727_v44 = vpop.permute.xlu1 %726 }
 0x550   :  { %v3142_v41 = vpop.eup %3141 }
 0x551   :  { %v567_v42 = vmul.f32 %v3142_v41, %v3136_v25  ;;  %v3144_v43 = vpop.eup %3143 }
 0x552   :  { %v571_v45 = vmul.f32 %v3144_v43, %v3134_v23  ;;  %v1029_v23 = vld [vmem:[%s3779_s10 + $0x18] sm:$0xff] }
 0x553   :  { %2853 = vmatmul.mubr.msk.f32.vlgmr.msra.gmra.mrb[4].mxu0 %vm529_vm3, %v567_v42  ;;  %v3045_v24 = vpack.c.bf16 %v1029_v23, %v1028_v22 }
 0x554   :  { %2861 = vmatpush3.msra.mxu0 %v727_v44  ;;  %2862 = vmatprep.mubr.msk.f32.mxu0 %vm3212_vm1, %v3211_v36  ;;  %v1136_v44 = vld [vmem:[%s3781_s12] sm:$0xff] }
 0x555   :  { %3034 = vmatprep.subr.bf16.mxu0 %v3033_v48 }
 0x557   :  { %2863 = vmatmul.mubr.msk.f32.vlgmr.msra.gmra.mrb[6].mxu0 %vm529_vm3, %v571_v45  ;;  %v1137_v45 = vld [vmem:[%s3781_s12 + $0x8] sm:$0xff] }
 0x558   :  { %3036 = vmatpush3.bf16.msra.mxu0 %v3033_v48  ;;  %v3049_v46 = vpack.c.bf16 %v1137_v45, %v1136_v44  ;;  %v1139_v48 = vld [vmem:[%s3781_s12 + $0x18] sm:$0xff] }
 0x559   :  { %3038 = vmatprep.subr.bf16.mxu0 %v3037_v51  ;;  %v3053_v49 = vpack.c.bf16 %v1139_v48, %v1138_v47 }
 0x55c   :  { %3040 = vmatpush3.bf16.msra.mxu0 %v3037_v51  ;;  %v1141_v51 = vld [vmem:[%s3781_s12 + $0x28] sm:$0xff] }
 0x55d   :  { %3050 = vmatprep.subr.bf16.mxu0 %v3049_v46 }
 0x5ed   :  { %v722_v52 = vpop.f32.mrb[6].mxu1 }
 0x5ee   :  { %v2859_v53 = vpop.f32.mrb[7].mxu1  ;;  %879 = vrot.lane.b32.xlu1 %v722_v52, %s3216_s4  ;;  %v3057_v52 = vpack.c.bf16 %v1141_v51, %v1140_v50  ;;  %v2659_v50 = vld [vmem:[%s3783_s14] ss:$0 sm:$0xff] }
 0x5ef   :  { %v1142_v53 = vld [vmem:[%s3781_s12 + $0x30] sm:$0xff] }
 0x5f1   :  { %v874_v54 = vpop.f32.mrb[8].mxu1 }
 0x5f2   :  { %884 = vrot.lane.b32.xlu1 %v874_v54, %s3216_s4  ;;  %v2869_v56 = vpop.f32.mrb[9].mxu1  ;;  %v1143_v54 = vld [vmem:[%s3781_s12 + $0x38] sm:$0xff] }
 0x5f3   :  { %v3061_v56 = vpack.c.bf16 %v1143_v54, %v1142_v53  ;;  %v2660_v54 = vld [vmem:[%s3784_s15] ss:$0 sm:$0xff] }
 0x626   :  { %v646_v57 = vpop.f32.mrb[4].mxu0 }
 0x627   :  { %v2854_v58 = vpop.f32.mrb[5].mxu0 }
 0x62a   :  { %v798_v60 = vpop.f32.mrb[6].mxu0 }
 0x62b   :  { %v2864_v61 = vpop.f32.mrb[7].mxu0 }
 0x660   :  { %v880_v62 = vpop.permute.xlu1 %879 }
 0x661   :  { %v882_v63 = vsel %vm226_vm2, %v646_v57, %v880_v62  ;;  %v2653_v57 = vld [vmem:[%s3780_s11] ss:$0 sm:$0xff] }
 0x662   :  { %2878 = vmatprep.mubr.msk.f32.mxu0 %vm70_vm0, %v882_v63 }
 0x664   :  { %v885_v0 = vpop.permute.xlu1 %884 }
 0x665   :  { %v887_v1 = vsel %vm226_vm2, %v798_v60, %v885_v0 }
 0x666   :  { %2879 = vmatmul.mubr.msk.f32.vlgmr.msra.gmra.mrb[8].mxu0 %vm70_vm0, %v887_v1 }
 0x667   :  { %3052 = vmatpush3.bf16.msra.mxu0 %v3049_v46 }
 0x668   :  { %3054 = vmatprep.subr.bf16.mxu0 %v3053_v49 }
 0x66b   :  { %3056 = vmatpush3.bf16.msra.mxu0 %v3053_v49 }
 0x66c   :  { %3058 = vmatprep.subr.bf16.mxu0 %v3057_v52 }
 0x66f   :  { %3060 = vmatpush3.bf16.msra.mxu0 %v3057_v52 }
 0x670   :  { %3062 = vmatprep.subr.bf16.mxu0 %v3061_v56 }
 0x673   :  { %3064 = vmatpush3.bf16.msra.mxu0 %v3061_v56 }
 0x674   :  { %2932 = vmatprep.subr.mxu0 %v3211_v36 }
 0x739   :  { %v2880_v3 = vpop.f32.mrb[8].mxu0 }
 0x73a   :  { %v977_v4 = vadd.f32 %v2880_v3, %v2648_v2  ;;  %v971_v5 = vpop.f32.mrb[9].mxu0 }
 0x73b   :  { %v972_v6 = vadd.f32 %v2648_v2, %v971_v5 }
 0x73c   :  { %v981_v7 = vadd.f32 %v977_v4, %v3356_v35 }
 0x73d   :  { %v980_v8 = vadd.f32 %v972_v6, %v3352_v33  ;;  %v1026_v33 = vld [vmem:[%s3779_s10] sm:$0xff] }
 0x73e   :  { %v987_v9 = vsel %vm70_vm0, %v981_v7, 0.0  ;;  %v3041_v21 = vpack.c.bf16 %v1027_v20, %v1026_v33 }
 0x73f   :  { %988 = vadd.xlane.f32.xlu1 %v987_v9  ;;  %v984_v10 = vsel %vm70_vm0, %v980_v8, 0.0 }
 0x740   :  { %985 = vadd.xlane.f32.xlu0 %v984_v10  ;;  %3042 = vmatprep.subr.bf16.mxu1 %v3041_v21 }
 0x741   :  { %3044 = vmatpush3.bf16.msra.mxu1 %v3041_v21 }
 0x742   :  { %3046 = vmatprep.subr.bf16.mxu1 %v3045_v24 }
 0x745   :  { %3048 = vmatpush3.bf16.msra.mxu1 %v3045_v24 }
 0x7cc   :  { %v989_v11 = vpop.xlane.xlu1 %988 }
 0x7cd   :  { %v991_v12 = vmul.f32 0.03125, %v989_v11  ;;  %v986_v13 = vpop.xlane.xlu0 %985 }
 0x7ce   :  { %v990_v14 = vmul.f32 0.03125, %v986_v13 }
 0x7cf   :  { %v993_v15 = vsub.f32 %v981_v7, %v991_v12 }
 0x7d0   :  { %v992_v16 = vsub.f32 %v980_v8, %v990_v14 }
 0x7d1   :  { %v995_v19 = vmul.f32 %v993_v15, %v993_v15 }
 0x7d2   :  { %v994_v17 = vmul.f32 %v992_v16, %v992_v16 }
 0x7d3   :  { %v999_v35 = vsel %vm70_vm0, %v995_v19, 0.0 }
 0x7d4   :  { %v996_v18 = vsel %vm70_vm0, %v994_v17, 0.0  ;;  %v2656_v17 = vld [vmem:[%s3782_s13] ss:$0 sm:$0xff] }
 0x7d5   :  { %997 = vadd.xlane.f32.xlu0 %v996_v18 }
 0x7d9   :  { %1000 = vadd.xlane.f32.xlu0 %v999_v35 }
 0x862   :  { %v998_v25 = vpop.xlane.xlu0 %997 }
 0x863   :  { %v1002_v26 = vmul.f32 0.03125, %v998_v25 }
 0x865   :  { %v1004_v27 = vadd.f32 1e-12, %v1002_v26 }
 0x866   :  { %v1001_v28 = vpop.xlane.xlu0 %1000 }
 0x867   :  { %3145 = vrsqrt.f32 %v1004_v27  ;;  %v1003_v29 = vmul.f32 0.03125, %v1001_v28 }
 0x869   :  { %v1005_v30 = vadd.f32 1e-12, %v1003_v29 }
 0x86b   :  { %3147 = vrsqrt.f32 %v1005_v30 }
 0x871   :  { %v3146_v31 = vpop.eup %3145 }
 0x872   :  { %v1008_v34 = vmul.f32 %v3146_v31, %v992_v16 }
 0x874   :  { %v1016_v38 = vmul.f32 %v2651_v32, %v1008_v34 }
 0x875   :  { %v3148_v39 = vpop.eup %3147 }
 0x876   :  { %v1009_v40 = vmul.f32 %v3148_v39, %v993_v15  ;;  %v1024_v41 = vadd.f32 %v2652_v37, %v1016_v38  ;;  %v2662_v38 = vld [vmem:[%s3798_s26 + $0x28] sm:$0xff] }
 0x878   :  { %v1017_v42 = vmul.f32 %v2651_v32, %v1009_v40  ;;  %2889 = vmatprep.mubr.msk.f32.mxu1 %vm70_vm0, %v1024_v41  ;;  %v2663_v40 = vld [vmem:[%s3798_s26 + $0x30] sm:$0xff] }
 0x87a   :  { %v1025_v43 = vadd.f32 %v2652_v37, %v1017_v42  ;;  %v2661_v37 = vld [vmem:[%s3798_s26 + $0x20] sm:$0xff] }
 0x87b   :  { %v3065_v39 = vpack.c.bf16 %v2662_v38, %v2661_v37 }
 0x87c   :  { %2890 = vmatmul.mubr.msk.f32.vlgmr.msra.gmra.mrb[10].mxu1 %vm70_vm0, %v1025_v43 }
 0x87d   :  { %3066 = vmatprep.subr.bf16.mxu1 %v3065_v39 }
 0x87e   :  { %3068 = vmatpush3.bf16.msra.mxu1 %v3065_v39 }
 0x94f   :  { %v2891_v58 = vpop.f32.mrb[10].mxu1 }
 0x950   :  { %v1115_v60 = vadd.f32 %v2891_v58, %v2653_v57  ;;  %v1109_v61 = vpop.f32.mrb[11].mxu1 }
 0x951   :  { %v1110_v62 = vadd.f32 %v2653_v57, %v1109_v61  ;;  %v2666_v61 = vld [vmem:[%s3774_s5 + $0x1] ss:$0 sm:$0xff] }
 0x952   :  { %v1121_v63 = vmul.f32 0.044715, %v1115_v60  ;;  %v1119_v14 = vmul.f32 0.5, %v1115_v60 }
 0x953   :  { %v1120_v0 = vmul.f32 0.044715, %v1110_v62  ;;  %v1118_v12 = vmul.f32 0.5, %v1110_v62 }
 0x954   :  { %v1123_v1 = vmul.f32 %v1121_v63, %v1115_v60 }
 0x955   :  { %v1122_v2 = vmul.f32 %v1120_v0, %v1110_v62 }
 0x956   :  { %v1125_v3 = vmul.f32 %v1123_v1, %v1115_v60 }
 0x957   :  { %v1124_v4 = vmul.f32 %v1122_v2, %v1110_v62 }
 0x958   :  { %v1127_v5 = vadd.f32 %v1125_v3, %v1115_v60 }
 0x959   :  { %v1126_v6 = vadd.f32 %v1124_v4, %v1110_v62 }
 0x95a   :  { %v1129_v7 = vmul.f32 0.7978846, %v1127_v5 }
 0x95b   :  { %v1128_v8 = vmul.f32 0.7978846, %v1126_v6 }
 0x95c   :  { %3149 = vtanh.f32 %v1129_v7 }
 0x95d   :  { %3151 = vtanh.f32 %v1128_v8 }
 0x966   :  { %v3150_v9 = vpop.eup %3149 }
 0x967   :  { %v3152_v10 = vpop.eup %3151  ;;  %v1133_v11 = vadd.f32 1.0, %v3150_v9 }
 0x968   :  { %v1132_v13 = vadd.f32 1.0, %v3152_v10 }
 0x969   :  { %v1135_v16 = vmul.f32 %v1133_v11, %v1119_v14 }
 0x96a   :  { %v1134_v15 = vmul.f32 %v1132_v13, %v1118_v12 }
 0x96c   :  { %2908 = vmatprep.mubr.msk.f32.mxu0 %vm1151_vm4, %v1134_v15 }
 0x96d   :  { %2909 = vmatmul.mubr.msk.f32.vlgmr.msra.gmra.mrb[10].mxu0 %vm1151_vm4, %v1135_v16 }
 0x96e   :  { %2934 = vmatprep.mubr.msk.f32.mxu0 %vm3212_vm1, %v3211_v36 }
 0xa40   :  { %v2910_v18 = vpop.f32.mrb[10].mxu0 }
 0xa41   :  { %v1230_v19 = vadd.f32 %v2910_v18, %v2656_v17  ;;  %v1224_v35 = vpop.f32.mrb[11].mxu0 }
 0xa42   :  { %v1225_v33 = vadd.f32 %v2656_v17, %v1224_v35 }
 0xa43   :  { %v1234_v20 = vadd.f32 %v1230_v19, %v1025_v43 }
 0xa44   :  { %v1233_v21 = vadd.f32 %v1225_v33, %v1024_v41  ;;  %v2664_v41 = vld [vmem:[%s3798_s26 + $0x38] sm:$0xff] }
 0xa45   :  { %v1240_v22 = vsel %vm70_vm0, %v1234_v20, 0.0  ;;  %v3069_v42 = vpack.c.bf16 %v2664_v41, %v2663_v40 }
 0xa46   :  { %1241 = vadd.xlane.f32.xlu1 %v1240_v22  ;;  %v1237_v23 = vsel %vm70_vm0, %v1233_v21, 0.0 }
 0xa47   :  { %1238 = vadd.xlane.f32.xlu0 %v1237_v23  ;;  %3070 = vmatprep.subr.bf16.mxu1 %v3069_v42 }
 0xa48   :  { %3072 = vmatpush3.bf16.msra.mxu1 %v3069_v42 }
 0xa49   :  { %2922 = vmatprep.subr.mxu1 %v3211_v36 }
 0xad3   :  { %v1242_v24 = vpop.xlane.xlu1 %1241 }
 0xad4   :  { %v1244_v25 = vmul.f32 0.03125, %v1242_v24  ;;  %v1239_v26 = vpop.xlane.xlu0 %1238 }
 0xad5   :  { %v1243_v27 = vmul.f32 0.03125, %v1239_v26 }
 0xad6   :  { %v1246_v28 = vsub.f32 %v1234_v20, %v1244_v25 }
 0xad7   :  { %v1245_v29 = vsub.f32 %v1233_v21, %v1243_v27 }
 0xad8   :  { %v1248_v30 = vmul.f32 %v1246_v28, %v1246_v28 }
 0xad9   :  { %v1247_v31 = vmul.f32 %v1245_v29, %v1245_v29 }
 0xada   :  { %v1252_v32 = vsel %vm70_vm0, %v1248_v30, 0.0 }
 0xadb   :  { %1253 = vadd.xlane.f32.xlu1 %v1252_v32  ;;  %v1249_v34 = vsel %vm70_vm0, %v1247_v31, 0.0 }
 0xadc   :  { %1250 = vadd.xlane.f32.xlu0 %v1249_v34 }
 0xb68   :  { %v1254_v43 = vpop.xlane.xlu1 %1253 }
 0xb69   :  { %v1256_v44 = vmul.f32 0.03125, %v1254_v43  ;;  %v1251_v45 = vpop.xlane.xlu0 %1250 }
 0xb6a   :  { %v1255_v46 = vmul.f32 0.03125, %v1251_v45 }
 0xb6b   :  { %v1258_v47 = vadd.f32 1e-12, %v1256_v44 }
 0xb6c   :  { %v1257_v48 = vadd.f32 1e-12, %v1255_v46 }
 0xb6d   :  { %3153 = vrsqrt.f32 %v1258_v47 }
 0xb6e   :  { %3155 = vrsqrt.f32 %v1257_v48 }
 0xb77   :  { %v3154_v49 = vpop.eup %3153 }
 0xb78   :  { %v3156_v51 = vpop.eup %3155  ;;  %v1262_v52 = vmul.f32 %v3154_v49, %v1246_v28 }
 0xb79   :  { %v1261_v53 = vmul.f32 %v3156_v51, %v1245_v29 }
 0xb7a   :  { %v1270_v56 = vmul.f32 %v2659_v50, %v1262_v52 }
 0xb7b   :  { %v1269_v57 = vmul.f32 %v2659_v50, %v1261_v53 }
 0xb7c   :  { %v3557_v60 = vadd.f32 %v2660_v54, %v1270_v56 }
 0xb7d   :  { %v3555_v58 = vadd.f32 %v2660_v54, %v1269_v57 }
 0xb7f   :  { %2919 = vmatprep.mubr.msk.f32.mxu1 %vm70_vm0, %v3555_v58 }
 0xb80   :  { %2920 = vmatmul.mubr.msk.f32.vlgmr.msra.gmra.mrb[12].mxu1 %vm70_vm0, %v3557_v60 }
 0xb81   :  { %2924 = vmatprep.mubr.msk.f32.mxu1 %vm3212_vm1, %v3211_v36 }
 0xc53   :  { %v2921_v62 = vpop.f32.mrb[12].mxu1 }
 0xc54   :  { %v3568_v63 = vadd.f32 %v2921_v62, %v2666_v61  ;;  %v1364_v0 = vpop.f32.mrb[13].mxu1 }
 0xc55   :  { %v3570_v1 = vadd.f32 %v2666_v61, %v1364_v0  ;;  %v2682_v0 = vld [vmem:[%s3775_s6 + $0x28] sm:$0xff] }
 0xc56   :  { %1377 = vrot.lane.b32.xlu1 %v3568_v63, %s3213_s27 }
 0xc57   :  { %1374 = vrot.lane.b32.xlu0 %v3570_v1, %s3213_s27 }
 0xc5a   :  { %1379 = vrot.lane.b32.xlu1 %v3570_v1, %s3214_s28 }
 0xcc8   :  { %v1378_v2 = vpop.permute.xlu1 %1377 }
 0xcc9   :  { %1607 = vrot.lane.b32.xlu0 %v1378_v2, %s3214_s28  ;;  %v1375_v3 = vpop.permute.xlu0 %1374 }
 0xcca   :  { %1455 = vrot.lane.b32.xlu1 %v1375_v3, %s3214_s28 }
 0xccc   :  { %v1380_v4 = vpop.permute.xlu1 %1379 }
 0xccd   :  { %2923 = vmatpush3.xpose.msk.msra.mxu1 %vm226_vm2, %v1380_v4 }
 0xcce   :  { %1531 = vrot.lane.b32.xlu1 %v3568_v63, %s3214_s28  ;;  %2927 = vmatprep.subr.mxu1 %v3211_v36 }
 0xcd0   :  { %2925 = vmatmul.mubr.msk.f32.vlgmr.msra.gmra.mrb[14].mxu1 %vm226_vm2, %v3570_v1 }
 0xcd1   :  { %2929 = vmatprep.mubr.msk.f32.mxu1 %vm3212_vm1, %v3211_v36 }
 0xd3b   :  { %v1608_v6 = vpop.permute.xlu0 %1607 }
 0xd3c   :  { %v1456_v5 = vpop.permute.xlu1 %1455 }
 0xd3d   :  { %2928 = vmatpush3.xpose.msk.msra.mxu1 %vm226_vm2, %v1456_v5 }
 0xd3e   :  { %2937 = vmatprep.subr.mxu1 %v3211_v36 }
 0xd40   :  { %2930 = vmatmul.mubr.msk.f32.vlgmr.msra.gmra.mrb[16].mxu1 %vm226_vm2, %v1375_v3  ;;  %v1532_v7 = vpop.permute.xlu1 %1531 }
 0xd41   :  { %2933 = vmatpush3.xpose.msk.msra.mxu0 %vm226_vm2, %v1532_v7  ;;  %2938 = vmatpush3.xpose.msk.msra.mxu1 %vm226_vm2, %v1608_v6 }
 0xd42   :  { %2939 = vmatprep.mubr.msk.f32.mxu1 %vm3212_vm1, %v3211_v36  ;;  %2947 = vmatprep.subr.mxu1 %v3211_v36 }
 0xd43   :  { %2942 = vmatprep.subr.mxu0 %v3211_v36 }
 0xd44   :  { %2935 = vmatmul.mubr.msk.f32.vlgmr.msra.gmra.mrb[12].mxu0 %vm226_vm2, %v3568_v63  ;;  %2940 = vmatmul.mubr.msk.f32.vlgmr.msra.gmra.mrb[18].mxu1 %vm226_vm2, %v1378_v2 }
 0xd45   :  { %2949 = vmatprep.mubr.msk.f32.mxu1 %vm3212_vm1, %v3211_v36  ;;  %2944 = vmatprep.mubr.msk.f32.mxu0 %vm3212_vm1, %v3211_v36 }
 0xda3   :  { %v1451_v8 = vpop.f32.mrb[14].mxu1 }
 0xda4   :  { %v2926_v9 = vpop.f32.mrb[15].mxu1  ;;  %v1452_v13 = vadd.f32 %v1451_v8, %v3416_v55 }
 0xda6   :  { %v1683_v33 = vsel %vm529_vm3, %v1452_v13, -inf }
 0xe13   :  { %v1527_v10 = vpop.f32.mrb[16].mxu1 }
 0xe14   :  { %v1528_v11 = vadd.f32 %v1527_v10, %v3416_v55  ;;  %v2931_v12 = vpop.f32.mrb[17].mxu1 }
 0xe16   :  { %v1686_v14 = vsel %vm529_vm3, %v1528_v11, -inf }
 0xe17   :  { %1687 = vmax.xlane.f32.xlu0 %v1686_v14  ;;  %v1603_v15 = vpop.f32.mrb[12].mxu0  ;;  %v1679_v16 = vpop.f32.mrb[18].mxu1 }
 0xe18   :  { %v1680_v17 = vadd.f32 %v1679_v16, %v3419_v59  ;;  %v2936_v18 = vpop.f32.mrb[13].mxu0  ;;  %v2941_v19 = vpop.f32.mrb[19].mxu1  ;;  %v1604_v35 = vadd.f32 %v1603_v15, %v3419_v59 }
 0xe1a   :  { %v1692_v20 = vsel %vm529_vm3, %v1680_v17, -inf  ;;  %v1689_v21 = vsel %vm529_vm3, %v1604_v35, -inf }
 0xe1b   :  { %1684 = vmax.xlane.f32.xlu0 %v1683_v33  ;;  %1693 = vmax.xlane.f32.xlu1 %v1692_v20 }
 0xe1f   :  { %1690 = vmax.xlane.f32.xlu0 %v1689_v21 }
 0xea4   :  { %v1688_v55 = vpop.xlane.xlu0 %1687 }
 0xea5   :  { %v1696_v22 = vsub.f32 %v1528_v11, %v1688_v55 }
 0xea7   :  { %v1701_v23 = vmul.f32 1.442695, %v1696_v22 }
 0xea8   :  { %v1694_v24 = vpop.xlane.xlu1 %1693  ;;  %v1685_v30 = vpop.xlane.xlu0 %1684 }
 0xea9   :  { %3157 = vpow2.f32 %v1701_v23  ;;  %v1698_v25 = vsub.f32 %v1680_v17, %v1694_v24  ;;  %v1695_v37 = vsub.f32 %v1452_v13, %v1685_v30  ;;  %v2686_v17 = vld [vmem:[%s3776_s7 + $0x1] ss:$0 sm:$0xff] }
 0xeab   :  { %v1705_v26 = vmul.f32 1.442695, %v1698_v25  ;;  %v1699_v38 = vmul.f32 1.442695, %v1695_v37  ;;  %v2696_v37 = vld [vmem:[%s3779_s10 + $0x38] sm:$0xff] }
 0xeac   :  { %v1691_v31 = vpop.xlane.xlu0 %1690 }
 0xead   :  { %3159 = vpow2.f32 %v1705_v26  ;;  %v1697_v32 = vsub.f32 %v1604_v35, %v1691_v31  ;;  %v2694_v31 = vld [vmem:[%s3779_s10 + $0x28] sm:$0xff] }
 0xeaf   :  { %v1703_v34 = vmul.f32 1.442695, %v1697_v32 }
 0xeb1   :  { %3161 = vpow2.f32 %v1703_v34  ;;  %v2695_v34 = vld [vmem:[%s3779_s10 + $0x30] sm:$0xff] }
 0xeb2   :  { %3163 = vpow2.f32 %v1699_v38  ;;  %v3085_v38 = vpack.c.bf16 %v2696_v37, %v2695_v34 }
 0xeb3   :  { %v3158_v27 = vpop.eup %3157 }
 0xeb4   :  { %v1710_v59 = vsel %vm529_vm3, %v3158_v27, 0.0 }
 0xeb5   :  { %1711 = vadd.xlane.f32.xlu0 %v1710_v59 }
 0xeb7   :  { %v3160_v28 = vpop.eup %3159 }
 0xeb8   :  { %v1716_v29 = vsel %vm529_vm3, %v3160_v28, 0.0 }
 0xeb9   :  { %1717 = vadd.xlane.f32.xlu1 %v1716_v29 }
 0xebb   :  { %v3162_v39 = vpop.eup %3161 }
 0xebc   :  { %v1713_v40 = vsel %vm529_vm3, %v3162_v39, 0.0  ;;  %v3164_v41 = vpop.eup %3163 }
 0xebd   :  { %v1707_v42 = vsel %vm529_vm3, %v3164_v41, 0.0 }
 0xeca   :  { %1955 = vrot.lane.b32.xlu1 %v1378_v2, %s3215_s0  ;;  %v2683_v2 = vld [vmem:[%s3775_s6 + $0x30] sm:$0xff] }
 0xecb   :  { %1803 = vrot.lane.b32.xlu0 %v1375_v3, %s3215_s0  ;;  %v2684_v3 = vld [vmem:[%s3775_s6 + $0x38] sm:$0xff] }
 0xecc   :  { %v3077_v4 = vpack.c.bf16 %v2684_v3, %v2683_v2  ;;  %v2706_v2 = vld [vmem:[%s3781_s12 + $0x68] sm:$0xff] }
 0xeea   :  { %1714 = vadd.xlane.f32.xlu0 %v1713_v40 }
 0xeee   :  { %1708 = vadd.xlane.f32.xlu1 %v1707_v42 }
 0xeff   :  { %1879 = vrot.lane.b32.xlu1 %v3568_v63, %s3215_s0  ;;  %v2681_v63 = vld [vmem:[%s3775_s6 + $0x20] sm:$0xff] }
 0xf00   :  { %1727 = vrot.lane.b32.xlu0 %v3570_v1, %s3215_s0  ;;  %v3073_v1 = vpack.c.bf16 %v2682_v0, %v2681_v63  ;;  %v2704_v63 = vld [vmem:[%s3781_s12 + $0x58] sm:$0xff] }
 0xf42   :  { %v1712_v43 = vpop.xlane.xlu0 %1711 }
 0xf43   :  { %3165 = vrcp.f32 %v1712_v43 }
 0xf46   :  { %v1804_v44 = vpop.permute.xlu0 %1803  ;;  %v1718_v45 = vpop.xlane.xlu1 %1717 }
 0xf47   :  { %2948 = vmatpush3.msra.mxu1 %v1804_v44  ;;  %3167 = vrcp.f32 %v1718_v45 }
 0xf48   :  { %2957 = vmatprep.subr.mxu1 %v3211_v36 }
 0xf4a   :  { %v1956_v48 = vpop.permute.xlu1 %1955 }
 0xf4d   :  { %v3166_v46 = vpop.eup %3165 }
 0xf4e   :  { %v1722_v47 = vmul.f32 %v3166_v46, %v3158_v27  ;;  %v2691_v46 = vld [vmem:[%s3777_s8 + $0x1] ss:$0 sm:$0xff] }
 0xf50   :  { %2950 = vmatmul.mubr.msk.f32.vlgmr.msra.gmra.mrb[20].mxu1 %vm529_vm3, %v1722_v47 }
 0xf51   :  { %2958 = vmatpush3.msra.mxu1 %v1956_v48  ;;  %2959 = vmatprep.mubr.msk.f32.mxu1 %vm3212_vm1, %v3211_v36  ;;  %v3168_v49 = vpop.eup %3167  ;;  %v2692_v48 = vld [vmem:[%s3778_s9 + $0x1] ss:$0 sm:$0xff] }
 0xf52   :  { %v1726_v50 = vmul.f32 %v3168_v49, %v3160_v28 }
 0xf54   :  { %2960 = vmatmul.mubr.msk.f32.vlgmr.msra.gmra.mrb[22].mxu1 %vm529_vm3, %v1726_v50 }
 0xf77   :  { %v1715_v51 = vpop.xlane.xlu0 %1714 }
 0xf7b   :  { %v1728_v52 = vpop.permute.xlu0 %1727  ;;  %v1709_v53 = vpop.xlane.xlu1 %1708 }
 0xf7c   :  { %2943 = vmatpush3.msra.mxu0 %v1728_v52  ;;  %3169 = vrcp.f32 %v1709_v53 }
 0xf7d   :  { %2952 = vmatprep.subr.mxu0 %v3211_v36  ;;  %3171 = vrcp.f32 %v1715_v51 }
 0xf7f   :  { %v1880_v61 = vpop.permute.xlu1 %1879 }
 0xf86   :  { %v3170_v54 = vpop.eup %3169 }
 0xf87   :  { %v1720_v56 = vmul.f32 %v3170_v54, %v3164_v41  ;;  %v3172_v57 = vpop.eup %3171 }
 0xf88   :  { %v1724_v62 = vmul.f32 %v3172_v57, %v3162_v39  ;;  %v2702_v57 = vld [vmem:[%s3781_s12 + $0x48] sm:$0xff] }
 0xf89   :  { %2945 = vmatmul.mubr.msk.f32.vlgmr.msra.gmra.mrb[14].mxu0 %vm529_vm3, %v1720_v56  ;;  %v2701_v56 = vld [vmem:[%s3781_s12 + $0x40] sm:$0xff] }
 0xf8a   :  { %2953 = vmatpush3.msra.mxu0 %v1880_v61  ;;  %2954 = vmatprep.mubr.msk.f32.mxu0 %vm3212_vm1, %v3211_v36  ;;  %v3089_v61 = vpack.c.bf16 %v2702_v57, %v2701_v56 }
 0xf8b   :  { %3074 = vmatprep.subr.bf16.mxu0 %v3073_v1 }
 0xf8d   :  { %2955 = vmatmul.mubr.msk.f32.vlgmr.msra.gmra.mrb[16].mxu0 %vm529_vm3, %v1724_v62  ;;  %v2703_v62 = vld [vmem:[%s3781_s12 + $0x50] sm:$0xff] }
 0xf8e   :  { %3076 = vmatpush3.bf16.msra.mxu0 %v3073_v1  ;;  %v3093_v0 = vpack.c.bf16 %v2704_v63, %v2703_v62  ;;  %v2705_v1 = vld [vmem:[%s3781_s12 + $0x60] sm:$0xff] }
 0xf8f   :  { %3078 = vmatprep.subr.bf16.mxu0 %v3077_v4  ;;  %v3097_v3 = vpack.c.bf16 %v2706_v2, %v2705_v1 }
 0xf92   :  { %3080 = vmatpush3.bf16.msra.mxu0 %v3077_v4  ;;  %v2707_v4 = vld [vmem:[%s3781_s12 + $0x70] sm:$0xff] }
 0xf93   :  { %3090 = vmatprep.subr.bf16.mxu0 %v3089_v61 }
0x1023   :  { %v1875_v5 = vpop.f32.mrb[20].mxu1 }
0x1024   :  { %v2951_v6 = vpop.f32.mrb[21].mxu1  ;;  %2032 = vrot.lane.b32.xlu1 %v1875_v5, %s3216_s4  ;;  %v2708_v5 = vld [vmem:[%s3781_s12 + $0x78] sm:$0xff] }
0x1025   :  { %v3101_v6 = vpack.c.bf16 %v2708_v5, %v2707_v4  ;;  %v2716_v4 = vld [vmem:[%s3784_s15 + $0x1] ss:$0 sm:$0xff] }
0x1027   :  { %v2027_v7 = vpop.f32.mrb[22].mxu1 }
0x1028   :  { %2037 = vrot.lane.b32.xlu1 %v2027_v7, %s3216_s4  ;;  %v2961_v8 = vpop.f32.mrb[23].mxu1  ;;  %v2698_v7 = vld [vmem:[%s3780_s11 + $0x1] ss:$0 sm:$0xff] }
0x105c   :  { %v1799_v9 = vpop.f32.mrb[14].mxu0 }
0x105d   :  { %v2946_v10 = vpop.f32.mrb[15].mxu0 }
0x1060   :  { %v1951_v11 = vpop.f32.mrb[16].mxu0 }
0x1061   :  { %v2956_v12 = vpop.f32.mrb[17].mxu0 }
0x1096   :  { %v2033_v13 = vpop.permute.xlu1 %2032 }
0x1097   :  { %v2035_v14 = vsel %vm226_vm2, %v1799_v9, %v2033_v13 }
0x1098   :  { %2970 = vmatprep.mubr.msk.f32.mxu0 %vm70_vm0, %v2035_v14 }
0x109a   :  { %v2038_v15 = vpop.permute.xlu1 %2037 }
0x109b   :  { %v2040_v16 = vsel %vm226_vm2, %v1951_v11, %v2038_v15 }
0x109c   :  { %2971 = vmatmul.mubr.msk.f32.vlgmr.msra.gmra.mrb[18].mxu0 %vm70_vm0, %v2040_v16 }
0x109d   :  { %3092 = vmatpush3.bf16.msra.mxu0 %v3089_v61 }
0x109e   :  { %3094 = vmatprep.subr.bf16.mxu0 %v3093_v0 }
0x10a1   :  { %3096 = vmatpush3.bf16.msra.mxu0 %v3093_v0  ;;  %v2715_v0 = vld [vmem:[%s3783_s14 + $0x1] ss:$0 sm:$0xff] }
0x10a2   :  { %3098 = vmatprep.subr.bf16.mxu0 %v3097_v3 }
0x10a5   :  { %3100 = vmatpush3.bf16.msra.mxu0 %v3097_v3 }
0x10a6   :  { %3102 = vmatprep.subr.bf16.mxu0 %v3101_v6 }
0x10a9   :  { %3104 = vmatpush3.bf16.msra.mxu0 %v3101_v6 }
0x116f   :  { %v2972_v18 = vpop.f32.mrb[18].mxu0 }
0x1170   :  { %v2132_v19 = vadd.f32 %v2972_v18, %v2686_v17  ;;  %v2126_v35 = vpop.f32.mrb[19].mxu0 }
0x1171   :  { %v2127_v33 = vadd.f32 %v2686_v17, %v2126_v35 }
0x1172   :  { %v2136_v20 = vadd.f32 %v2132_v19, %v3557_v60 }
0x1173   :  { %v2135_v21 = vadd.f32 %v2127_v33, %v3555_v58  ;;  %v2693_v58 = vld [vmem:[%s3779_s10 + $0x20] sm:$0xff] }
0x1174   :  { %v2144_v55 = vsel %vm70_vm0, %v2136_v20, 0.0  ;;  %v3081_v32 = vpack.c.bf16 %v2694_v31, %v2693_v58 }
0x1175   :  { %2145 = vadd.xlane.f32.xlu1 %v2144_v55  ;;  %v2141_v22 = vsel %vm70_vm0, %v2135_v21, 0.0 }
0x1176   :  { %2142 = vadd.xlane.f32.xlu0 %v2141_v22  ;;  %3082 = vmatprep.subr.bf16.mxu1 %v3081_v32 }
0x1177   :  { %3084 = vmatpush3.bf16.msra.mxu1 %v3081_v32 }
0x1178   :  { %3086 = vmatprep.subr.bf16.mxu1 %v3085_v38 }
0x117b   :  { %3088 = vmatpush3.bf16.msra.mxu1 %v3085_v38 }
0x1202   :  { %v2146_v23 = vpop.xlane.xlu1 %2145 }
0x1203   :  { %v2148_v24 = vmul.f32 0.03125, %v2146_v23  ;;  %v2143_v25 = vpop.xlane.xlu0 %2142 }
0x1204   :  { %v2147_v26 = vmul.f32 0.03125, %v2143_v25 }
0x1205   :  { %v2150_v27 = vsub.f32 %v2136_v20, %v2148_v24 }
0x1206   :  { %v2149_v59 = vsub.f32 %v2135_v21, %v2147_v26 }
0x1207   :  { %v2152_v30 = vmul.f32 %v2150_v27, %v2150_v27 }
0x1208   :  { %v2151_v28 = vmul.f32 %v2149_v59, %v2149_v59 }
0x1209   :  { %v2156_v60 = vsel %vm70_vm0, %v2152_v30, 0.0 }
0x120a   :  { %v2153_v29 = vsel %vm70_vm0, %v2151_v28, 0.0 }
0x120b   :  { %2154 = vadd.xlane.f32.xlu0 %v2153_v29 }
0x120f   :  { %2157 = vadd.xlane.f32.xlu0 %v2156_v60 }
0x1298   :  { %v2155_v39 = vpop.xlane.xlu0 %2154 }
0x1299   :  { %v2159_v40 = vmul.f32 0.03125, %v2155_v39 }
0x129b   :  { %v2161_v41 = vadd.f32 1e-12, %v2159_v40 }
0x129c   :  { %v2158_v42 = vpop.xlane.xlu0 %2157 }
0x129d   :  { %3173 = vrsqrt.f32 %v2161_v41  ;;  %v2160_v43 = vmul.f32 0.03125, %v2158_v42 }
0x129f   :  { %v2162_v44 = vadd.f32 1e-12, %v2160_v43 }
0x12a1   :  { %3175 = vrsqrt.f32 %v2162_v44 }
0x12a7   :  { %v3174_v45 = vpop.eup %3173 }
0x12a8   :  { %v2165_v47 = vmul.f32 %v3174_v45, %v2149_v59 }
0x12aa   :  { %v2173_v49 = vmul.f32 %v2691_v46, %v2165_v47  ;;  %v2447_v47 = vld [vmem:[%s3785_s16 + $0x8] sm:$0xff] }
0x12ab   :  { %v3176_v50 = vpop.eup %3175 }
0x12ac   :  { %v2166_v51 = vmul.f32 %v3176_v50, %v2150_v27  ;;  %v2181_v52 = vadd.f32 %v2692_v48, %v2173_v49  ;;  %v2710_v27 = vld [vmem:[%s3782_s13 + $0x1] ss:$0 sm:$0xff]  ;;  %v2448_v49 = vld [vmem:[%s3785_s16 + $0x10] sm:$0xff]  ;;  %v2449_v50 = vld [vmem:[%s3785_s16 + $0x18] sm:$0xff] }
0x12ae   :  { %v2174_v53 = vmul.f32 %v2691_v46, %v2166_v51  ;;  %2981 = vmatprep.mubr.msk.f32.mxu1 %vm70_vm0, %v2181_v52  ;;  %v2446_v46 = vld [vmem:[%s3785_s16] sm:$0xff]  ;;  %v3217_v51 = vmov 0.0|0.0  }
0x12af   :  { %3105 = vmatprep.subr.bf16.mxu1 %v3217_v51 }
0x12b0   :  { %v2182_v54 = vadd.f32 %v2692_v48, %v2174_v53  ;;  %v3106_v48 = vpack.c.bf16 %v2447_v47, %v2446_v46 }
0x12b2   :  { %2982 = vmatmul.mubr.msk.f32.vlgmr.msra.gmra.mrb[24].mxu1 %vm70_vm0, %v2182_v54 }
0x12b3   :  { %3011 = vmatprep.mubr.msk.f32.mxu1 %vm3212_vm1, %v3211_v36  ;;  %3107 = vmatpush3.bf16.msra.mxu1 %v3106_v48 }
0x12b4   :  { %3108 = vmatprep.subr.bf16.mxu1 %v3217_v51 }
0x1385   :  { %v2983_v8 = vpop.f32.mrb[24].mxu1 }
0x1386   :  { %v2274_v9 = vadd.f32 %v2983_v8, %v2698_v7  ;;  %v2268_v10 = vpop.f32.mrb[25].mxu1 }
0x1387   :  { %v2269_v11 = vadd.f32 %v2698_v7, %v2268_v10 }
0x1388   :  { %v2280_v12 = vmul.f32 0.044715, %v2274_v9  ;;  %v2278_v24 = vmul.f32 0.5, %v2274_v9 }
0x1389   :  { %v2279_v13 = vmul.f32 0.044715, %v2269_v11  ;;  %v2277_v22 = vmul.f32 0.5, %v2269_v11 }
0x138a   :  { %v2282_v14 = vmul.f32 %v2280_v12, %v2274_v9  ;;  %v2532_v12 = vld [vmem:[%s3787_s18 + $0x8] sm:$0xff] }
0x138b   :  { %v2281_v15 = vmul.f32 %v2279_v13, %v2269_v11  ;;  %v2533_v13 = vld [vmem:[%s3787_s18 + $0x10] sm:$0xff] }
0x138c   :  { %v2284_v16 = vmul.f32 %v2282_v14, %v2274_v9 }
0x138d   :  { %v2283_v17 = vmul.f32 %v2281_v15, %v2269_v11  ;;  %v2534_v15 = vld [vmem:[%s3787_s18 + $0x18] sm:$0xff] }
0x138e   :  { %v2286_v18 = vadd.f32 %v2284_v16, %v2274_v9  ;;  %v3115_v16 = vpack.c.bf16 %v2534_v15, %v2533_v13 }
0x138f   :  { %v2285_v19 = vadd.f32 %v2283_v17, %v2269_v11  ;;  %v2531_v11 = vld [vmem:[%s3787_s18] sm:$0xff]  ;;  %s3218_s18 = smov [#allocation2]  }
0x1390   :  { %v2288_v35 = vmul.f32 0.7978846, %v2286_v18  ;;  %v3112_v14 = vpack.c.bf16 %v2532_v12, %v2531_v11  ;;  %s2623_s5 = sshll.u32 %s3218_s18, 4  ;;  %s2624_s5 = int_to_ptr.vmem [resolvable:$true] %s2623_s5 }
0x1391   :  { %v2287_v33 = vmul.f32 0.7978846, %v2285_v19  ;;  %p3192_p1 = scmp.lt.s32.totalorder %s2624_s5, %s2624_s5 }
0x1392   :  { %3177 = vtanh.f32 %v2288_v35 }
0x1393   :  { %3179 = vtanh.f32 %v2287_v33  ;;  %v2719_v33 = vld [vmem:[%s3788_s19] ss:$0 sm:$0xff] }
0x139c   :  { %v3178_v20 = vpop.eup %3177 }
0x139d   :  { %v3180_v21 = vpop.eup %3179  ;;  %v2292_v55 = vadd.f32 1.0, %v3178_v20 }
0x139e   :  { %v2291_v23 = vadd.f32 1.0, %v3180_v21 }
0x139f   :  { %v2294_v26 = vmul.f32 %v2292_v55, %v2278_v24 }
0x13a0   :  { %v2293_v25 = vmul.f32 %v2291_v23, %v2277_v22 }
0x13a2   :  { %3000 = vmatprep.mubr.msk.f32.mxu0 %vm1151_vm4, %v2293_v25 }
0x13a3   :  { %3001 = vmatmul.mubr.msk.f32.vlgmr.msra.gmra.mrb[20].mxu0 %vm1151_vm4, %v2294_v26 }
0x1476   :  { %v3002_v59 = vpop.f32.mrb[20].mxu0 }
0x1477   :  { %v2390_v28 = vadd.f32 %v3002_v59, %v2710_v27  ;;  %v2384_v29 = vpop.f32.mrb[21].mxu0 }
0x1478   :  { %v2385_v30 = vadd.f32 %v2710_v27, %v2384_v29 }
0x1479   :  { %v2394_v60 = vadd.f32 %v2390_v28, %v2182_v54 }
0x147a   :  { %v2393_v58 = vadd.f32 %v2385_v30, %v2181_v52  ;;  %v3109_v52 = vpack.c.bf16 %v2449_v50, %v2448_v49 }
0x147b   :  { %v2402_v31 = vsel %vm70_vm0, %v2394_v60, 0.0 }
0x147c   :  { %2403 = vadd.xlane.f32.xlu0 %v2402_v31  ;;  %v2399_v32 = vsel %vm70_vm0, %v2393_v58, 0.0  ;;  %3110 = vmatpush3.bf16.msra.mxu1 %v3109_v52 }
0x147d   :  { %2400 = vadd.xlane.f32.xlu1 %v2399_v32  ;;  %3111 = vmatprep.subr.bf16.mxu1 %v3217_v51 }
0x1509   :  { %v2404_v34 = vpop.xlane.xlu0 %2403 }
0x150a   :  { %v2406_v37 = vmul.f32 0.03125, %v2404_v34  ;;  %v2401_v38 = vpop.xlane.xlu1 %2400 }
0x150b   :  { %v2405_v39 = vmul.f32 0.03125, %v2401_v38 }
0x150c   :  { %v2408_v40 = vsub.f32 %v2394_v60, %v2406_v37 }
0x150d   :  { %v2407_v41 = vsub.f32 %v2393_v58, %v2405_v39 }
0x150e   :  { %v2410_v42 = vmul.f32 %v2408_v40, %v2408_v40 }
0x150f   :  { %v2409_v43 = vmul.f32 %v2407_v41, %v2407_v41 }
0x1510   :  { %v2414_v44 = vsel %vm70_vm0, %v2410_v42, 0.0 }
0x1511   :  { %2415 = vadd.xlane.f32.xlu0 %v2414_v44  ;;  %v2411_v45 = vsel %vm70_vm0, %v2409_v43, 0.0 }
0x1512   :  { %2412 = vadd.xlane.f32.xlu1 %v2411_v45 }
0x159e   :  { %v2416_v53 = vpop.xlane.xlu0 %2415 }
0x159f   :  { %v2418_v54 = vmul.f32 0.03125, %v2416_v53  ;;  %v2413_v56 = vpop.xlane.xlu1 %2412 }
0x15a0   :  { %v2417_v57 = vmul.f32 0.03125, %v2413_v56 }
0x15a1   :  { %v2420_v61 = vadd.f32 1e-12, %v2418_v54 }
0x15a2   :  { %v2419_v62 = vadd.f32 1e-12, %v2417_v57 }
0x15a3   :  { %3181 = vrsqrt.f32 %v2420_v61 }
0x15a4   :  { %3183 = vrsqrt.f32 %v2419_v62 }
0x15ad   :  { %v3182_v63 = vpop.eup %3181 }
0x15ae   :  { %v3184_v1 = vpop.eup %3183  ;;  %v2424_v2 = vmul.f32 %v3182_v63, %v2408_v40 }
0x15af   :  { %v2423_v3 = vmul.f32 %v3184_v1, %v2407_v41 }
0x15b0   :  { %v2432_v5 = vmul.f32 %v2715_v0, %v2424_v2 }
0x15b1   :  { %v2431_v6 = vmul.f32 %v2715_v0, %v2423_v3 }
0x15b2   :  { %v2440_v7 = vadd.f32 %v2716_v4, %v2432_v5 }
0x15b3   :  { %v2439_v8 = vadd.f32 %v2716_v4, %v2431_v6 }
0x15b4   :  { %v2442_v9 = vrot.slane %v2440_v7, 7 }
0x15b6   :  { %v2445_v10 = vsel %vm2444_vm5, %v2439_v8, %v2442_v9 }
0x15b7   :  { %3012 = vmatmul.mubr.msk.f32.vlgmr.msra.gmra.mrb[26].mxu1 %vm70_vm0, %v2445_v10 }
0x15b8   :  { %3022 = vmatprep.mubr.msk.f32.mxu1 %vm3212_vm1, %v3211_v36  ;;  %3113 = vmatpush3.bf16.msra.mxu1 %v3112_v14  ;;  %v2717_v36 = vld [vmem:[%s3786_s17] ss:$0 sm:$0xff]  ;;  %s3187_s17 = scalar_lea.vmem %s2624_s5, 32 }
0x15b9   :  { %3114 = vmatprep.subr.bf16.mxu1 %v3217_v51  ;;  %p3188_p0 = scmp.ne.s32.totalorder %s2624_s5, %s3187_s17  ;;  %p3193_p2 = scmp.lt.s32.totalorder %s3187_s17, %s3187_s17 }
0x15bb   :  { %p3194_p3 = por %p3193_p2, %p3192_p1 }
0x15bc   :  { %3116 = vmatpush3.bf16.msra.mxu1 %v3115_v16 }
0x15bd   :  { %p3195_p4 = pnand %p3194_p3, %p3188_p0 }
0x168a   :  { %v2526_v17 = vpop.f32.mrb[26].mxu1 }
0x168b   :  { %v2527_v18 = vadd.f32 %v2717_v36, %v2526_v17  ;;  %v3013_v19 = vpop.f32.mrb[27].mxu1 }
0x168d   :  { %3185 = vtanh.f32 %v2527_v18 }
0x1697   :  { %v3186_v35 = vpop.eup %3185 }
0x1698   :  { %3023 = vmatmul.mubr.msk.f32.vlgmr.msra.gmra.mrb[28].mxu1 %vm70_vm0, %v3186_v35 }
0x176b   :  { %v2611_v20 = vpop.f32.mrb[28].mxu1 }
0x176c   :  { %v2612_v21 = vadd.f32 %v2719_v33, %v2611_v20  ;;  %v3024_v55 = vpop.f32.mrb[29].mxu1 }
0x176e   :  { %2616 = vst.msk [vmem:[#allocation2] sm:$0x3] %vm2615_vm6, %v2612_v21 }
0x176f   :  { %3198 = shalt.err (!%p3195_p4)
}
0x1770   :  { %s3199_s13 = scalar_lea.hbm %s3789_s20, 32 }
0x1771   :  { %p3200_p5 = scmp.ne.s32.totalorder %s3789_s20, %s3199_s13  ;;  %p3203_p6 = scmp.lt.u32.totalorder %s3199_s13, %s3789_s20 }
0x1773   :  { %p3205_p7 = pnand %p3203_p6, %p3200_p5 }
0x1775   :  { %3208 = shalt.err (!%p3205_p7)
}
0x1776   :  { %2626 = dma.vmem_to_hbm [thread:$0]  %s2624_s5, 32, %s3789_s20, [#allocation3]  }
0x1777   :  { %3209 = dma.done.wait [#allocation3], 32  }
0x1778   :  { %3210 = vsyncadd [#allocation3], 4294967264 }
0x1779   :  { %2630 = vsyncpa [#allocation3], 1 }

</bundles_post_ra>
